<compile_context>
chip_gen: v7x
topology: tpu7x:2x2x1
jax: 0.10.0
libtpu: 0.0.40
codegen_flags: <defaults>
</compile_context>

<pallas_src>
import functools

import jax
import jax.numpy as jnp
import numpy as np
from jax import lax
from jax.experimental import pallas as pl
from jax.experimental.pallas import tpu as pltpu


def _round_up(x, m):
    return ((x + m - 1) // m) * m


def _sine_layer_kernel(x_ref, w_ref, b_ref, o_ref, *, omega_0):
    # x_ref: (TM, IN), w_ref: (OUT_P, IN)  -> contract IN with IN (no transpose).
    acc = lax.dot_general(
        x_ref[...], w_ref[...],
        dimension_numbers=(((1,), (1,)), ((), ())),
        preferred_element_type=jnp.float32)          # (TM, OUT_P) on the MXU
    acc = acc + b_ref[...]                           # (1, OUT_P) broadcast
    o_ref[...] = jnp.sin(omega_0 * acc).astype(o_ref.dtype)


def sine_layer(x, weight, bias, omega_0=30.0, block_m=512):
    """Pallas SineLayer forward: sin(omega_0 * (x @ weight.T + bias)).

    Args:
      x:      (B, IN)   float32
      weight: (OUT, IN) float32   (PyTorch nn.Linear layout, NOT transposed)
      bias:   (OUT,)    float32
      block_m: batch tile size (sweep 512-2048 for large B; clamped to B).
    Returns:
      (B, OUT) float32
    """
    B, IN = x.shape
    OUT = weight.shape[0]

    # --- Lane-dense output: pad OUT up to a multiple of 128. ---------------
    # (In a real model do this once at parameter-init time, not per call.)
    OUT_P = _round_up(OUT, 128)
    if OUT_P != OUT:
        weight = jnp.pad(weight, ((0, OUT_P - OUT), (0, 0)))
        bias = jnp.pad(bias, (0, OUT_P - OUT))
    b2 = bias.reshape(1, OUT_P)

    # --- Batch tiling (grid over B, weight/bias resident in VMEM). ---------
    TM = _round_up(min(block_m, _round_up(B, 8)), 8)
    B_P = _round_up(B, TM)
    if B_P != B:
        x = jnp.pad(x, ((0, B_P - B), (0, 0)))
    grid = (B_P // TM,)

    kernel = functools.partial(_sine_layer_kernel, omega_0=float(omega_0))

    out = pl.pallas_call(
        kernel,
        out_shape=jax.ShapeDtypeStruct((B_P, OUT_P), x.dtype),
        grid_spec=pltpu.PrefetchScalarGridSpec(
            num_scalar_prefetch=0,
            grid=grid,
            in_specs=[
                pl.BlockSpec((TM, IN), lambda i: (i, 0)),       # streamed
                pl.BlockSpec((OUT_P, IN), lambda i: (0, 0)),    # resident W
                pl.BlockSpec((1, OUT_P), lambda i: (0, 0)),     # resident b
            ],
            out_specs=pl.BlockSpec((TM, OUT_P), lambda i: (i, 0)),
        ),
        compiler_params=pltpu.CompilerParams(
            dimension_semantics=("parallel",),   # independent batch tiles
        ),
    )(x, weight, b2)

    # Strip the batch / output-lane padding.
    return out[:B, :OUT]


def init_sine_layer_params(key, in_features, out_features, is_first=False,
                           omega_0=30.0):
    """Deterministic SIREN init matching SineLayer.init_weights."""
    kw, kb = jax.random.split(key)
    if is_first:
        bound_w = 1.0 / in_features
    else:
        bound_w = np.sqrt(6.0 / in_features) / omega_0
    weight = jax.random.uniform(
        kw, (out_features, in_features), jnp.float32,
        minval=-bound_w, maxval=bound_w)
    # nn.Linear default bias init: U(-1/sqrt(in), 1/sqrt(in))
    bound_b = 1.0 / np.sqrt(in_features)
    bias = jax.random.uniform(
        kb, (out_features,), jnp.float32, minval=-bound_b, maxval=bound_b)
    return weight, bias


if __name__ == "__main__":
    key = jax.random.PRNGKey(0)
    k_x, k_p = jax.random.split(key)

    # Small demo shapes. B is deliberately NOT a multiple of the batch tile
    # to exercise the padded tail path; OUT=64 exercises the lane padding.
    B, IN, OUT = 500, 32, 64
    omega_0 = 30.0
    is_first = True

    x = jax.random.normal(k_x, (B, IN), dtype=jnp.float32)
    weight, bias = init_sine_layer_params(k_p, IN, OUT,
                                          is_first=is_first, omega_0=omega_0)

    out = sine_layer(x, weight, bias, omega_0=omega_0, block_m=128)
    out = jax.block_until_ready(out)

    # Reference check in plain JAX.
    ref = jnp.sin(omega_0 * (x @ weight.T + bias))
    np.testing.assert_allclose(np.asarray(out), np.asarray(ref),
                               rtol=1e-5, atol=1e-5)

    # TODO(synk): fusing a full multi-layer SIREN stack into one kernel (all
    # layer weights VMEM-resident, activations kept in a VMEM scratch) would
    # remove per-layer HBM activation round trips; out of scope for this
    # single-layer module.
    print("KERNEL_OK")
</pallas_src>

<mosaic_0001>
module attributes {stable_mosaic.version = 11 : i64} {
  func.func @_sine_layer_kernel(%arg0: i32, %arg1: memref<128x32xf32, #tpu.memory_space<vmem>>, %arg2: memref<128x32xf32, #tpu.memory_space<vmem>>, %arg3: memref<1x128xf32, #tpu.memory_space<vmem>>, %arg4: memref<128x128xf32, #tpu.memory_space<vmem>>) attributes {dimension_semantics = [#tpu.dimension_semantics<parallel>], iteration_bounds = array<i64: 4>, scalar_prefetch = 0 : i64, scratch_operands = 0 : i64, tpu.core_type = #tpu.core_type<tc>, window_params = [{transform_indices = @transform_0, window_bounds = array<i64: 128, 32>}, {pipeline_mode = #tpu.pipeline_mode<synchronous>, transform_indices = @transform_1, window_bounds = array<i64: 128, 32>}, {pipeline_mode = #tpu.pipeline_mode<synchronous>, transform_indices = @transform_2, window_bounds = array<i64: 1, 128>}, {transform_indices = @transform_3, window_bounds = array<i64: 128, 128>}]} {
    %c0 = arith.constant 0 : index
    %c0_0 = arith.constant 0 : index
    %0 = vector.load %arg1[%c0, %c0_0] : memref<128x32xf32, #tpu.memory_space<vmem>>, vector<128x32xf32>
    %c0_1 = arith.constant 0 : index
    %c0_2 = arith.constant 0 : index
    %1 = vector.load %arg2[%c0_1, %c0_2] : memref<128x32xf32, #tpu.memory_space<vmem>>, vector<128x32xf32>
    %cst = arith.constant dense<0.000000e+00> : vector<128x128xf32>
    %2 = tpu.matmul %0, %1, %cst {dimension_numbers = #tpu.dot_dimension_numbers<[1], [1], [0], [0], [0, 0, 1, 0], [], []>} : vector<128x32xf32>, vector<128x32xf32>, vector<128x128xf32> -> vector<128x128xf32>
    %c0_3 = arith.constant 0 : index
    %c0_4 = arith.constant 0 : index
    %3 = vector.load %arg3[%c0_3, %c0_4] : memref<1x128xf32, #tpu.memory_space<vmem>>, vector<1x128xf32>
    %4 = vector.broadcast %3 : vector<1x128xf32> to vector<128x128xf32>
    %5 = arith.addf %2, %4 : vector<128x128xf32>
    %cst_5 = arith.constant 3.000000e+01 : f32
    %6 = vector.broadcast %cst_5 : f32 to vector<128x128xf32>
    %7 = arith.mulf %6, %5 : vector<128x128xf32>
    %8 = math.sin %7 : vector<128x128xf32>
    %c0_6 = arith.constant 0 : index
    %c0_7 = arith.constant 0 : index
    %9 = vector.load %arg4[%c0_6, %c0_7] : memref<128x128xf32, #tpu.memory_space<vmem>>, vector<128x128xf32>
    tpu.vector_store %arg4[%c0_6, %c0_7], %8 {strides = array<i32>} : memref<128x128xf32, #tpu.memory_space<vmem>>, vector<128x128xf32>,
    return
  }
  func.func @transform_0(%arg0: i32) -> (i32, i32) {
    %c0_i32 = arith.constant 0 : i32
    %c0_i32_0 = arith.constant 0 : i32
    return %arg0, %c0_i32 : i32, i32
  }
  func.func @transform_1(%arg0: i32) -> (i32, i32) {
    %c0_i32 = arith.constant 0 : i32
    %c0_i32_0 = arith.constant 0 : i32
    %c0_i32_1 = arith.constant 0 : i32
    return %c0_i32, %c0_i32_0 : i32, i32
  }
  func.func @transform_2(%arg0: i32) -> (i32, i32) {
    %c0_i32 = arith.constant 0 : i32
    %c0_i32_0 = arith.constant 0 : i32
    %c0_i32_1 = arith.constant 0 : i32
    return %c0_i32, %c0_i32_0 : i32, i32
  }
  func.func @transform_3(%arg0: i32) -> (i32, i32) {
    %c0_i32 = arith.constant 0 : i32
    %c0_i32_0 = arith.constant 0 : i32
    return %arg0, %c0_i32 : i32, i32
  }
}

</mosaic_0001>

<bundles_post_ra>
// kernel: tpu_custom_call.1
= control target key start
LH: loop header
LB: loop body
LE: loop exit
PB: predicated region body
PF: predicated region fallthrough
CT: control target
= control target key end

     0   :  { %8 = vsyncpa [#allocation3], 0  ;;  %s4358_s0 = inlined_call_operand.vmem [shape: f32[512,32], index: 0, kind: input, shape index: {}]   ;;  %s4359_s1 = inlined_call_operand.vmem [shape: f32[128,32], index: 1, kind: input, shape index: {}]   ;;  %s4360_s2 = inlined_call_operand.vmem [shape: f32[1,128], index: 2, kind: input, shape index: {}]   ;;  %s4361_s3 = inlined_call_operand.hbm [shape: f32[512,128], index: 3, kind: output, shape index: {}]  }
   0x1   :  { %10 = vsyncpa [#allocation3 + $0x1], 0  ;;  %s2757_s12 = smov 0   ;;  %s2759_s13 = smov 0  }
   0x2   :  { %s2761_s14 = smov 0   ;;  %s2763_s15 = smov 0  }
   0x3 LB: > { %s2778_s16 = sadd.s32 4294967295, %s2726_s15   ;;  %s2225_s17 = sadd.s32 4294967294, %s2726_s15   ;;  %s2726_s15 = sphi %s2763_s15, %s4397_s15   ;;  %s2722_s14 = sphi %s2761_s14, %s4396_s14   ;;  %s2718_s13 = sphi %s2759_s13, %s4395_s13   ;;  %s2714_s12 = sphi %s2757_s12, %s4394_s12  }
   0x4   : > { %s2782_s18 = sadd.s32 1, %s2726_s15   ;;  %s91_s19 = sadd.s32 1, %s2722_s14 }
   0x5   : > { %s88_s20 = ssub.s32 %s2726_s15, %s2782_s18  ;;  %p101_p0 = scmp.ne.s32.totalorder %s2722_s14, %s2718_s13 }
   0x6   : > { %p89_p1 = scmp.eq.s32.totalorder %s88_s20, 0  ;;  %p102_p2 = scmp.eq.s32.totalorder %s2778_s16, 3 }
   0x7   : > { %p107_p3 = scmp.ne.s32.totalorder %s2718_s13, %s2714_s12  ;;  %p108_p4 = scmp.eq.s32.totalorder %s2225_s17, 3 }
   0x8   : > { %s2793_s21 = scalar_select %p89_p1, %s2722_s14, %s91_s19  }
   0x9   : > { %p2795_p5 = por %p102_p2, %p101_p0  ;;  %p2799_p6 = por %p108_p4, %p107_p3 }
   0xa   : > { %p2228_p7 = scmp.ge.s32.totalorder %s2726_s15, 1  ;;  %p141_p8 = scmp.lt.s32.totalorder %s2726_s15, 5 }
   0xc   : > { %p142_p9 = pnand %p2228_p7, %p141_p8 }
   0xd   : > { %v188_v0 = vld [vmem:[%s4359_s1] sm:$0xff] (!%p142_p9)  ;;  %v189_v1 = vld [vmem:[%s4359_s1 + $0x8] sm:$0xff] (!%p142_p9)  ;;  %vm211_vm0 = vcmask (!%p142_p9), 261120   ;;  %v190_v2 = vld [vmem:[%s4359_s1 + $0x10] sm:$0xff] (!%p142_p9)  ;;  %s2230_s30 = sshll.u32 (!%p142_p9), %s2778_s16, 4  ;;  %s2334_s7 = sshll.u32 (!%p142_p9), %s2778_s16, 11 }
   0xe   : > { %145 = sbr.rel (%p142_p9) target bundleno = 748 (0x2ec), region = 32  ;;  %v2423_v3 = vpack.c.bf16 (!%p142_p9), %v189_v1, %v188_v0  ;;  %vm2817_vm1 = vmpackc.low (!%p142_p9), %vm211_vm0, %vm211_vm0  ;;  %v191_v5 = vld [vmem:[%s4359_s1 + $0x18] sm:$0xff] (!%p142_p9)  ;;  %p166_p10 = scmp.lt.s32.totalorder (!%p142_p9), %s2230_s30, 63  ;;  %v192_v7 = vld [vmem:[%s4359_s1 + $0x20] sm:$0xff] (!%p142_p9) }
   0xf   : > { %v2429_v6 = vpack.c.bf16 (!%p142_p9), %v191_v5, %v190_v2  ;;  %v193_v8 = vld [vmem:[%s4359_s1 + $0x28] sm:$0xff] (!%p142_p9)  ;;  %v194_v12 = vld [vmem:[%s4359_s1 + $0x30] sm:$0xff] (!%p142_p9)  ;;  %v195_v13 = vld [vmem:[%s4359_s1 + $0x38] sm:$0xff] (!%p142_p9)  ;;  %s4309_s11 = scalar_lea.hbm (!%p142_p9), %s4361_s3, %s2334_s7  ;;  %s2734_s20 = smov (!%p142_p9), [#allocation2]  }
  0x10   : > { %2425 = vmatprep.subr.msk.bf16.mxu0 (!%p142_p9), %vm2817_vm1, %v2423_v3  ;;  %2471 = vmatprep.subr.msk.bf16.mxu1 (!%p142_p9), %vm2817_vm1, %v2423_v3  ;;  %v2435_v11 = vpack.c.bf16 (!%p142_p9), %v193_v8, %v192_v7  ;;  %v2441_v14 = vpack.c.bf16 (!%p142_p9), %v195_v13, %v194_v12  ;;  %v196_v15 = vld [vmem:[%s4359_s1 + $0x40] sm:$0xff] (!%p142_p9)  ;;  %v197_v16 = vld [vmem:[%s4359_s1 + $0x48] sm:$0xff] (!%p142_p9)  ;;  %v198_v18 = vld [vmem:[%s4359_s1 + $0x50] sm:$0xff] (!%p142_p9)  ;;  %s2668_s24 = sshll.u32 (!%p142_p9), %s2734_s20, 4  ;;  %s2669_s24 = int_to_ptr.vmem [resolvable:$false] %s2668_s24 }
  0x11   : > { %2428 = vmatpush3.bf16.xpose.msk.msra.mxu0 (!%p142_p9), %vm2817_vm1, %v2423_v3  ;;  %2479 = vmatpush3.bf16.xpose.msk.msra.mxu1 (!%p142_p9), %vm2817_vm1, %v2423_v3  ;;  %v2447_v17 = vpack.c.bf16 (!%p142_p9), %v197_v16, %v196_v15  ;;  %v199_v19 = vld [vmem:[%s4359_s1 + $0x58] sm:$0xff] (!%p142_p9)  ;;  %v200_v21 = vld [vmem:[%s4359_s1 + $0x60] sm:$0xff] (!%p142_p9)  ;;  %v201_v22 = vld [vmem:[%s4359_s1 + $0x68] sm:$0xff] (!%p142_p9)  ;;  %s2670_s25 = scalar_lea.vmem (!%p142_p9), %s2669_s24, 4096 }
  0x12   : > { %2431 = vmatprep.subr.msk.bf16.mxu0 (!%p142_p9), %vm2817_vm1, %v2429_v6  ;;  %2472 = vmatprep.subr.msk.bf16.mxu1 (!%p142_p9), %vm2817_vm1, %v2429_v6  ;;  %v2453_v20 = vpack.c.bf16 (!%p142_p9), %v199_v19, %v198_v18  ;;  %v2459_v23 = vpack.c.bf16 (!%p142_p9), %v201_v22, %v200_v21  ;;  %v202_v24 = vld [vmem:[%s4359_s1 + $0x70] sm:$0xff] (!%p142_p9)  ;;  %v203_v25 = vld [vmem:[%s4359_s1 + $0x78] sm:$0xff] (!%p142_p9)  ;;  %v2964_v41 = vld [vmem:[%s4360_s2] ss:$0 sm:$0xff] (!%p142_p9)  ;;  %v2728_v21 = vmov (!%p142_p9), 683565275  }
  0x13   : > { %v2465_v26 = vpack.c.bf16 (!%p142_p9), %v203_v25, %v202_v24  ;;  %v2729_v25 = vmov (!%p142_p9), 2475754826  }
  0x15   : > { %s4399_s30 = smov (!%p166_p10, %s2230_s30), 63 }
  0x16   : > { %s2231_s6 = sshll.u32 %s4399_s30, 3 }
  0x17   : > { %s2845_s19 = scalar_lea.vmem %s4358_s0, %s2231_s6 }
  0x18   : > { %v172_v9 = vld [vmem:[%s2845_s19] sm:$0xff]  ;;  %v173_v27 = vld [vmem:[%s2845_s19 + $0x8] sm:$0xff]  ;;  %v174_v29 = vld [vmem:[%s2845_s19 + $0x10] sm:$0xff] }
  0x19   : > { %v180_v10 = vld [vmem:[%s2845_s19 + $0x40] sm:$0xff]  ;;  %2399 = vmatprep.mubr.msk.f32.mxu0 %vm211_vm0, %v172_v9  ;;  %2434 = vmatpush3.bf16.xpose.msk.msra.mxu0 %vm2817_vm1, %v2429_v6  ;;  %v181_v28 = vld [vmem:[%s2845_s19 + $0x48] sm:$0xff]  ;;  %v182_v30 = vld [vmem:[%s2845_s19 + $0x50] sm:$0xff] }
  0x1a   : > { %2411 = vmatprep.mubr.msk.f32.mxu1 %vm211_vm0, %v180_v10  ;;  %2480 = vmatpush3.bf16.xpose.msk.msra.mxu1 %vm2817_vm1, %v2429_v6  ;;  %v175_v31 = vld [vmem:[%s2845_s19 + $0x18] sm:$0xff]  ;;  %v176_v33 = vld [vmem:[%s2845_s19 + $0x20] sm:$0xff]  ;;  %v177_v35 = vld [vmem:[%s2845_s19 + $0x28] sm:$0xff] }
  0x1b   : > { %2437 = vmatprep.subr.msk.bf16.mxu0 %vm2817_vm1, %v2435_v11  ;;  %2473 = vmatprep.subr.msk.bf16.mxu1 %vm2817_vm1, %v2435_v11  ;;  %v183_v32 = vld [vmem:[%s2845_s19 + $0x58] sm:$0xff]  ;;  %v184_v34 = vld [vmem:[%s2845_s19 + $0x60] sm:$0xff]  ;;  %v185_v36 = vld [vmem:[%s2845_s19 + $0x68] sm:$0xff] }
  0x1c   : > { %v178_v37 = vld [vmem:[%s2845_s19 + $0x30] sm:$0xff]  ;;  %v179_v39 = vld [vmem:[%s2845_s19 + $0x38] sm:$0xff] }
  0x1d   : > { %v186_v38 = vld [vmem:[%s2845_s19 + $0x70] sm:$0xff]  ;;  %v187_v40 = vld [vmem:[%s2845_s19 + $0x78] sm:$0xff]  ;;  %s162_s19 = sand.u32 1, %s2718_s13  }
  0x1e   : > { %s2229_s28 = sshll.u32 %s162_s19, 7  ;;  %s4317_s16 = scalar_lea.sflag [#allocation3], %s162_s19 }
  0x1f   : > { %s3292_s29 = scalar_lea.vmem [#allocation2], %s2229_s28 }
  0x20   : > { %s2163_s8 = sshll.u32 %s3292_s29, 4  ;;  %s4311_s8 = int_to_ptr.vmem [resolvable:$true] %s2163_s8 }
  0x21   : > { %2440 = vmatpush3.bf16.xpose.msk.msra.mxu0 %vm2817_vm1, %v2435_v11  ;;  %s2664_s17 = scalar_lea.vmem %s4311_s8, 2048  ;;  %p2671_p0 = scmp.lt.s32.totalorder %s4311_s8, %s2669_s24 }
  0x22   : > { %2481 = vmatpush3.bf16.xpose.msk.msra.mxu1 %vm2817_vm1, %v2435_v11  ;;  %2443 = vmatprep.subr.msk.bf16.mxu0 %vm2817_vm1, %v2441_v14  ;;  %p2665_p11 = scmp.ne.s32.totalorder %s4311_s8, %s2664_s17  ;;  %p2672_p1 = scmp.lt.s32.totalorder %s2670_s25, %s2664_s17 }
  0x23   : > { %2474 = vmatprep.subr.msk.bf16.mxu1 %vm2817_vm1, %v2441_v14 }
  0x24   : > { %p2666_p12 = pnand %p2665_p11, %p2795_p5  ;;  %p2673_p2 = por %p2672_p1, %p2671_p0 }
  0x26   : > { %p2667_p13 = pneg %p2666_p12 }
  0x28   : > { %p2674_p3 = pnand %p2673_p2, %p2667_p13 }
  0x29   : > { %2446 = vmatpush3.bf16.xpose.msk.msra.mxu0 %vm2817_vm1, %v2441_v14 }
  0x2a   : > { %2482 = vmatpush3.bf16.xpose.msk.msra.mxu1 %vm2817_vm1, %v2441_v14  ;;  %2449 = vmatprep.subr.msk.bf16.mxu0 %vm2817_vm1, %v2447_v17 }
  0x2b   : > { %2475 = vmatprep.subr.msk.bf16.mxu1 %vm2817_vm1, %v2447_v17 }
  0x31   : > { %2452 = vmatpush3.bf16.xpose.msk.msra.mxu0 %vm2817_vm1, %v2447_v17 }
  0x32   : > { %2483 = vmatpush3.bf16.xpose.msk.msra.mxu1 %vm2817_vm1, %v2447_v17  ;;  %2455 = vmatprep.subr.msk.bf16.mxu0 %vm2817_vm1, %v2453_v20 }
  0x33   : > { %2476 = vmatprep.subr.msk.bf16.mxu1 %vm2817_vm1, %v2453_v20 }
  0x39   : > { %2458 = vmatpush3.bf16.xpose.msk.msra.mxu0 %vm2817_vm1, %v2453_v20 }
  0x3a   : > { %2484 = vmatpush3.bf16.xpose.msk.msra.mxu1 %vm2817_vm1, %v2453_v20  ;;  %2461 = vmatprep.subr.msk.bf16.mxu0 %vm2817_vm1, %v2459_v23 }
  0x3b   : > { %2477 = vmatprep.subr.msk.bf16.mxu1 %vm2817_vm1, %v2459_v23 }
  0x41   : > { %2464 = vmatpush3.bf16.xpose.msk.msra.mxu0 %vm2817_vm1, %v2459_v23 }
  0x42   : > { %2485 = vmatpush3.bf16.xpose.msk.msra.mxu1 %vm2817_vm1, %v2459_v23  ;;  %2467 = vmatprep.subr.msk.bf16.mxu0 %vm2817_vm1, %v2465_v26 }
  0x43   : > { %2478 = vmatprep.subr.msk.bf16.mxu1 %vm2817_vm1, %v2465_v26 }
  0x49   : > { %2470 = vmatpush3.bf16.xpose.msk.msra.mxu0 %vm2817_vm1, %v2465_v26 }
  0x4a   : > { %2486 = vmatpush3.bf16.xpose.msk.msra.mxu1 %vm2817_vm1, %v2465_v26 }
  0x50   : > { %2400 = vmatmul.mubr.msk.f32.vlgmr.msra.gmra.mrb[0].mxu0 %vm211_vm0, %v173_v27  ;;  %v2730_v27 = vmov 2131351028  }
  0x51   : > { %2412 = vmatmul.mubr.msk.f32.vlgmr.msra.gmra.mrb[0].mxu1 %vm211_vm0, %v181_v28  ;;  %2402 = vmatprep.mubr.msk.f32.mxu0 %vm211_vm0, %v174_v29  ;;  %v2731_v29 = vmov 2102212464  }
  0x52   : > { %2414 = vmatprep.mubr.msk.f32.mxu1 %vm211_vm0, %v182_v30 }
  0x54   : > { %2403 = vmatmul.mubr.msk.f32.gmra.mrb[2].mxu0 %vm211_vm0, %v175_v31  ;;  %v2732_v31 = vmov 920167782  }
  0x55   : > { %2415 = vmatmul.mubr.msk.f32.gmra.mrb[2].mxu1 %vm211_vm0, %v183_v32  ;;  %2405 = vmatprep.mubr.msk.f32.mxu0 %vm211_vm0, %v176_v33 }
  0x56   : > { %2417 = vmatprep.mubr.msk.f32.mxu1 %vm211_vm0, %v184_v34 }
  0x58   : > { %2406 = vmatmul.mubr.msk.f32.gmra.mrb[4].mxu0 %vm211_vm0, %v177_v35 }
  0x59   : > { %2418 = vmatmul.mubr.msk.f32.gmra.mrb[4].mxu1 %vm211_vm0, %v185_v36  ;;  %2408 = vmatprep.mubr.msk.f32.mxu0 %vm211_vm0, %v178_v37 }
  0x5a   : > { %2420 = vmatprep.mubr.msk.f32.mxu1 %vm211_vm0, %v186_v38  ;;  %v2733_v38 = vmov 1326507024  }
  0x5c   : > { %2409 = vmatmul.mubr.msk.f32.gmra.mrb[6].mxu0 %vm211_vm0, %v179_v39 }
  0x5d   : > { %2421 = vmatmul.mubr.msk.f32.gmra.mrb[6].mxu1 %vm211_vm0, %v187_v40 }
 0x123   : > { %v2401_v42 = vpop.f32.mrb[0].mxu0 }
 0x124   : > { %v2413_v43 = vpop.f32.mrb[0].mxu1  ;;  %v380_v44 = vadd.f32 %v2401_v42, %v2964_v41  ;;  %v374_v46 = vpop.f32.mrb[1].mxu0 }
 0x125   : > { %v420_v45 = vadd.f32 %v2413_v43, %v2964_v41  ;;  %v414_v47 = vpop.f32.mrb[1].mxu1  ;;  %v375_v48 = vadd.f32 %v2964_v41, %v374_v46 }
 0x126   : > { %v2969_v49 = vmul.f32 30.0, %v380_v44  ;;  %v415_v5 = vadd.f32 %v2964_v41, %v414_v47 }
 0x127   : > { %v2971_v50 = vmul.f32 30.0, %v420_v45  ;;  %v2973_v51 = vmul.f32 30.0, %v375_v48  ;;  %v2975_v52 = vpop.f32.mrb[2].mxu0 }
 0x128   : > { %v2977_v53 = vpop.f32.mrb[2].mxu1  ;;  %v573_v54 = vand.u32 2147483647, %v2969_v49  ;;  %v576_v55 = vand.u32 2139095040, %v2969_v49  ;;  %v2981_v56 = vpop.f32.mrb[3].mxu0  ;;  %v2994_v15 = vmul.f32 30.0, %v415_v5 }
 0x129   : > { %v1405_v57 = vand.u32 2147483647, %v2971_v50  ;;  %v1408_v58 = vand.u32 2139095040, %v2971_v50  ;;  %v472_v63 = vand.u32 2139095040, %v2973_v51  ;;  %v469_v8 = vand.u32 2147483647, %v2973_v51 }
 0x12a   : > { %v577_v59 = vshrl.u32 %v576_v55, 23  ;;  %v580_v60 = vand.u32 8388607, %v573_v54  ;;  %v2992_v10 = vpop.f32.mrb[3].mxu1  ;;  %vm3081_vm14 = vcmp.le.f32.partialorder %v573_v54, 0.7853982 }
 0x12b   : > { %v1409_v61 = vshrl.u32 %v1408_v58, 23  ;;  %v1412_v62 = vand.u32 8388607, %v1405_v57  ;;  %v473_v2 = vshrl.u32 %v472_v63, 23  ;;  %v3002_v18 = vand.u32 8388607, %v469_v8 }
 0x12c   : > { %v2269_v0 = vadd.s32 4294967169, %v577_v59  ;;  %v581_v3 = vor.u32 8388608, %v580_v60  ;;  %vm575_vm15 = vcmp.lt.s32.totalorder %v2969_v49, 0 }
 0x12d   : > { %v2301_v1 = vadd.s32 4294967169, %v1409_v61  ;;  %v1413_v6 = vor.u32 8388608, %v1412_v62  ;;  %v2265_v9 = vadd.s32 4294967169, %v473_v2 }
 0x12e   : > { %v583_v4 = vadd.s32 1, %v2269_v0  ;;  %v2996_v16 = vshll.u32 %v581_v3, 8 }
 0x12f   : > { %v1415_v7 = vadd.s32 1, %v2301_v1  ;;  %v2998_v17 = vshll.u32 %v1413_v6, 8  ;;  %v3004_v19 = vadd.s32 1, %v2265_v9 }
 0x130   : > { %vm584_vm2 = vcmp.gt.s32.totalorder %v583_v4, 0 }
 0x131   : > { %v585_v11 = vsel %vm584_vm2, %v583_v4, 0  ;;  %vm1416_vm3 = vcmp.gt.s32.totalorder %v1415_v7, 0  ;;  %vm480_vm8 = vcmp.gt.s32.totalorder %v3004_v19, 0 }
 0x132   : > { %v586_v12 = vshrl.u32 %v585_v11, 5  ;;  %v587_v13 = vand.u32 31, %v585_v11  ;;  %v1417_v14 = vsel %vm1416_vm3, %v1415_v7, 0 }
 0x133   : > { %v3007_v23 = vshrl.u32 %v1417_v14, 5  ;;  %v1419_v24 = vand.u32 31, %v1417_v14 }
 0x134   : > { %v588_v20 = vsub.s32 32, %v587_v13  ;;  %v590_v22 = vshll.u32 %v2728_v21, %v587_v13  ;;  %v593_v26 = vshll.u32 %v2729_v25, %v587_v13  ;;  %v596_v28 = vshll.u32 %v2730_v27, %v587_v13 }
 0x135   : > { %v599_v30 = vshll.u32 %v2731_v29, %v587_v13  ;;  %v602_v32 = vshll.u32 %v2732_v31, %v587_v13  ;;  %vm605_vm4 = vcmp.lt.s32.totalorder %v586_v12, 1  ;;  %vm606_vm5 = vcmp.lt.s32.totalorder %v586_v12, 2 }
 0x136   : > { %v591_v33 = vshrl.u32 %v2729_v25, %v588_v20  ;;  %v594_v34 = vshrl.u32 %v2730_v27, %v588_v20  ;;  %v597_v35 = vshrl.u32 %v2731_v29, %v588_v20  ;;  %v589_v36 = vshrl.u32 %v2728_v21, %v588_v20 }
 0x137   : > { %v600_v37 = vshrl.u32 %v2732_v31, %v588_v20  ;;  %v603_v39 = vshrl.u32 %v2733_v38, %v588_v20  ;;  %v1420_v44 = vsub.s32 32, %v1419_v24  ;;  %vm607_vm6 = vcmp.lt.s32.totalorder %v586_v12, 3 }
 0x138   : > { %v592_v40 = vor.u32 %v591_v33, %v590_v22  ;;  %v595_v42 = vor.u32 %v594_v34, %v593_v26  ;;  %v598_v43 = vor.u32 %v597_v35, %v596_v28  ;;  %vm608_vm7 = vcmp.lt.s32.totalorder %v586_v12, 4 }
 0x139   : > { %v601_v45 = vor.u32 %v600_v37, %v599_v30  ;;  %v604_v46 = vor.u32 %v603_v39, %v602_v32  ;;  %v1422_v62 = vshll.u32 %v2728_v21, %v1419_v24  ;;  %v1423_v1 = vshrl.u32 %v2729_v25, %v1420_v44 }
 0x13a   : > { %v609_v47 = vsel %vm605_vm4, %v589_v36, %v592_v40  ;;  %v610_v48 = vsel %vm608_vm7, %v598_v43, 2102212464  ;;  %v613_v55 = vsel %vm605_vm4, %v592_v40, %v595_v42  ;;  %v617_v58 = vsel %vm605_vm4, %v595_v42, %v598_v43 }
 0x13b   : > { %v611_v59 = vsel %vm607_vm6, %v595_v42, %v610_v48  ;;  %v614_v60 = vsel %vm608_vm7, %v601_v45, 920167782  ;;  %v618_v61 = vsel %vm608_vm7, %v604_v46, 1326507024  ;;  %v1425_v2 = vshll.u32 %v2729_v25, %v1419_v24 }
 0x13c   : > { %v615_v63 = vsel %vm607_vm6, %v598_v43, %v614_v60  ;;  %v619_v0 = vsel %vm607_vm6, %v601_v45, %v618_v61  ;;  %v612_v3 = vsel %vm606_vm5, %v609_v47, %v611_v59  ;;  %v1426_v6 = vshrl.u32 %v2730_v27, %v1420_v44 }
 0x13d   : > { %v616_v4 = vsel %vm606_vm5, %v613_v55, %v615_v63  ;;  %v620_v5 = vsel %vm606_vm5, %v617_v58, %v619_v0  ;;  %v1424_v14 = vor.u32 %v1423_v1, %v1422_v62  ;;  %v1428_v22 = vshll.u32 %v2730_v27, %v1419_v24 }
 0x13e   : > { %v3031_v7 = vmul.u32.u64.low %v2996_v16, %v620_v5  ;;  %v3032_v9 = vmul.u32.u64.high %v2996_v16, %v620_v5, %v3031_v7  ;;  %v3035_v11 = vmul.u32.u64.low %v2996_v16, %v616_v4  ;;  %v3036_v13 = vmul.u32.u64.high %v2996_v16, %v616_v4, %v3035_v11 }
 0x13f   : > { %v1427_v20 = vor.u32 %v1426_v6, %v1425_v2  ;;  %v1429_v26 = vshrl.u32 %v2731_v29, %v1420_v44  ;;  %v1421_v12 = vshrl.u32 %v2728_v21, %v1420_v44  ;;  %v1431_v28 = vshll.u32 %v2731_v29, %v1419_v24  ;;  %v3071_v2 = vpop.f32.mrb[4].mxu0 }
 0x140   : > { %v1432_v30 = vshrl.u32 %v2732_v31, %v1420_v44  ;;  %v1435_v32 = vshrl.u32 %v2733_v38, %v1420_v44  ;;  %v628_v33 = vmul.u32 %v2996_v16, %v612_v3  ;;  %v1434_v35 = vshll.u32 %v2732_v31, %v1419_v24 }
 0x141   : > { %v1430_v34 = vor.u32 %v1429_v26, %v1428_v22  ;;  %vm1437_vm9 = vcmp.lt.s32.totalorder %v3007_v23, 1  ;;  %vm630_vm10 = vc.u32 %v3032_v9, %v3035_v11  ;;  %v631_v36 = vadd.s32 1, %v3036_v13 }
 0x142   : > { %v1433_v37 = vor.u32 %v1432_v30, %v1431_v28  ;;  %vm1438_vm11 = vcmp.lt.s32.totalorder %v3007_v23, 2  ;;  %v1436_v39 = vor.u32 %v1435_v32, %v1434_v35  ;;  %vm1439_vm12 = vcmp.lt.s32.totalorder %v3007_v23, 3 }
 0x143   : > { %vm1440_vm13 = vcmp.lt.s32.totalorder %v3007_v23, 4  ;;  %v1445_v40 = vsel %vm1437_vm9, %v1424_v14, %v1427_v20  ;;  %v632_v16 = vsel %vm630_vm10, %v631_v36, %v3036_v13  ;;  %v1449_v43 = vsel %vm1437_vm9, %v1427_v20, %v1430_v34 }
 0x144   : > { %v1442_v42 = vsel %vm1440_vm13, %v1430_v34, 2102212464  ;;  %v1446_v24 = vsel %vm1440_vm13, %v1433_v37, 920167782  ;;  %v633_v44 = vadd.s32 %v632_v16, %v628_v33  ;;  %v1441_v45 = vsel %vm1437_vm9, %v1421_v12, %v1424_v14 }
 0x145   : > { %v1447_v46 = vsel %vm1439_vm12, %v1430_v34, %v1446_v24  ;;  %v1450_v47 = vsel %vm1440_vm13, %v1436_v39, 1326507024  ;;  %v1443_v48 = vsel %vm1439_vm12, %v1427_v20, %v1442_v42  ;;  %v481_v59 = vsel %vm480_vm8, %v3004_v19, 0 }
 0x146   : > { %v1448_v55 = vsel %vm1438_vm11, %v1445_v40, %v1447_v46  ;;  %v1451_v58 = vsel %vm1439_vm12, %v1433_v37, %v1450_v47  ;;  %v634_v60 = vadd.s32 536870912, %v633_v44  ;;  %v1444_v4 = vsel %vm1438_vm11, %v1441_v45, %v1443_v48 }
 0x147   : > { %v1452_v61 = vsel %vm1438_vm11, %v1449_v43, %v1451_v58  ;;  %v3063_v62 = vmul.u32.u64.low %v2998_v17, %v1448_v55  ;;  %v3064_v63 = vmul.u32.u64.high %v2998_v17, %v1448_v55, %v3063_v62  ;;  %v483_v19 = vand.u32 31, %v481_v59 }
 0x148   : > { %v3068_v0 = vmul.u32.u64.low %v2998_v17, %v1452_v61  ;;  %v3069_v1 = vmul.u32.u64.high %v2998_v17, %v1452_v61, %v3068_v0  ;;  %v635_v3 = vshrl.u32 %v634_v60, 30  ;;  %v1301_v5 = vand.u32 2147483647, %v2994_v15 }
 0x149   : > { %v477_v6 = vor.u32 8388608, %v3002_v18  ;;  %v1304_v7 = vand.u32 2139095040, %v2994_v15  ;;  %v1463_v14 = vadd.s32 1, %v3064_v63  ;;  %v484_v20 = vsub.s32 32, %v483_v19 }
 0x14a   : > { %v636_v13 = vshll.u32 %v635_v3, 30  ;;  %v1460_v23 = vmul.u32 %v2998_v17, %v1444_v4  ;;  %vm1462_vm0 = vc.u32 %v3069_v1, %v3063_v62  ;;  %v659_v26 = vsub.s32 4, %v635_v3 }
 0x14b   : > { %v1464_v12 = vsel %vm1462_vm0, %v1463_v14, %v3064_v63  ;;  %v3094_v28 = vand.u32 8388607, %v1301_v5  ;;  %v487_v30 = vshrl.u32 %v2729_v25, %v484_v20  ;;  %v3097_v32 = vshll.u32 %v477_v6, 8 }
 0x14c   : > { %v3089_v18 = vsub.s32 %v633_v44, %v636_v13  ;;  %v1465_v54 = vadd.s32 %v1464_v12, %v1460_v23  ;;  %v1305_v33 = vshrl.u32 %v1304_v7, 23  ;;  %v629_v17 = vadd.s32 %v3035_v11, %v3032_v9 }
 0x14d   : > { %v490_v35 = vshrl.u32 %v2730_v27, %v484_v20  ;;  %v493_v36 = vshrl.u32 %v2731_v29, %v484_v20  ;;  %v3104_v39 = vshrl.u32 %v481_v59, 5  ;;  %v486_v40 = vshll.u32 %v2728_v21, %v483_v19 }
 0x14e   : > { %v639_v34 = vsub.s32 0, %v3089_v18  ;;  %v1466_v37 = vadd.s32 536870912, %v1465_v54  ;;  %v489_v16 = vshll.u32 %v2729_v25, %v483_v19  ;;  %v660_v24 = vsel %vm575_vm15, %v659_v26, %v635_v3 }
 0x14f   : > { %v492_v9 = vshll.u32 %v2730_v27, %v483_v19  ;;  %v496_v11 = vshrl.u32 %v2732_v31, %v484_v20  ;;  %v488_v44 = vor.u32 %v487_v30, %v486_v40  ;;  %v495_v45 = vshll.u32 %v2731_v29, %v483_v19 }
 0x150   : > { %v2270_v42 = vmin.u32 %v639_v34, %v3089_v18  ;;  %v3113_v43 = vshrl.u32 %v1466_v37, 30  ;;  %v499_v46 = vshrl.u32 %v2733_v38, %v484_v20  ;;  %v491_v48 = vor.u32 %v490_v35, %v489_v16 }
 0x151   : > { %v494_v55 = vor.u32 %v493_v36, %v492_v9  ;;  %v498_v58 = vshll.u32 %v2732_v31, %v483_v19  ;;  %v497_v60 = vor.u32 %v496_v11, %v495_v45  ;;  %vm501_vm1 = vcmp.lt.s32.totalorder %v3104_v39, 1 }
 0x152   : > { %v641_v47 = vclz %v2270_v42  ;;  %v1468_v59 = vshll.u32 %v3113_v43, 30  ;;  %v2297_v61 = vadd.s32 4294967169, %v1305_v33  ;;  %v662_v0 = vsel %vm3081_vm14, 0, %v660_v24 }
 0x153   : > { %v500_v3 = vor.u32 %v499_v46, %v498_v58  ;;  %vm504_vm2 = vcmp.lt.s32.totalorder %v3104_v39, 4  ;;  %vm502_vm3 = vcmp.lt.s32.totalorder %v3104_v39, 2  ;;  %vm503_vm4 = vcmp.lt.s32.totalorder %v3104_v39, 3 }
 0x154   : > { %v2271_v63 = vadd.s32 4294967294, %v641_v47  ;;  %v3123_v4 = vsub.s32 %v1465_v54, %v1468_v59  ;;  %v510_v19 = vsel %vm504_vm2, %v497_v60, 920167782  ;;  %v485_v6 = vshrl.u32 %v2728_v21, %v484_v20 }
 0x155   : > { %v509_v7 = vsel %vm501_vm1, %v488_v44, %v491_v48  ;;  %v511_v13 = vsel %vm503_vm4, %v494_v55, %v510_v19  ;;  %v666_v23 = vadd.s32 3, %v662_v0  ;;  %v513_v12 = vsel %vm501_vm1, %v491_v48, %v494_v55  ;;  %v3167_v0 = vpop.f32.mrb[4].mxu1 }
 0x156   : > { %vm2272_vm5 = vcmp.lt.s32.totalorder %v2271_v63, 0  ;;  %v1471_v26 = vsub.s32 0, %v3123_v4  ;;  %vm1407_vm6 = vcmp.lt.s32.totalorder %v2971_v50, 0  ;;  %v506_v20 = vsel %vm504_vm2, %v494_v55, 2102212464 }
 0x157   : > { %v644_v14 = vsel %vm2272_vm5, 0, %v2271_v63  ;;  %v514_v33 = vsel %vm504_vm2, %v500_v3, 1326507024  ;;  %v512_v36 = vsel %vm502_vm3, %v509_v7, %v511_v13  ;;  %v1311_v24 = vadd.s32 1, %v2297_v61 }
 0x158   : > { %v645_v54 = vsub.s32 32, %v644_v14  ;;  %v649_v30 = vsub.s32 4294967266, %v644_v14  ;;  %v646_v34 = vshll.u32 %v3089_v18, %v644_v14  ;;  %v2302_v35 = vmin.u32 %v1471_v26, %v3123_v4 }
 0x159   : > { %v515_v37 = vsel %vm503_vm4, %v497_v60, %v514_v33  ;;  %v1491_v11 = vsub.s32 4, %v3113_v43  ;;  %v505_v18 = vsel %vm501_vm1, %v485_v6, %v488_v44  ;;  %v507_v45 = vsel %vm503_vm4, %v491_v48, %v506_v20 }
 0x15a   : > { %v647_v40 = vshrl.u32 %v629_v17, %v645_v54  ;;  %v650_v16 = vadd.s32 127, %v649_v30  ;;  %v516_v42 = vsel %vm502_vm3, %v513_v12, %v515_v37  ;;  %v1473_v9 = vclz %v2302_v35 }
 0x15b   : > { %v3156_v55 = vmul.u32.u64.low %v3097_v32, %v516_v42  ;;  %v3157_v58 = vmul.u32.u64.high %v3097_v32, %v516_v42, %v3156_v55  ;;  %v3160_v59 = vmul.u32.u64.low %v3097_v32, %v512_v36  ;;  %v3161_v60 = vmul.u32.u64.high %v3097_v32, %v512_v36, %v3160_v59 }
 0x15c   : > { %v648_v46 = vor.u32 %v647_v40, %v646_v34  ;;  %v651_v47 = vshll.u32 %v650_v16, 23  ;;  %v2303_v17 = vadd.s32 4294967294, %v1473_v9  ;;  %vm1312_vm7 = vcmp.gt.s32.totalorder %v1311_v24, 0 }
 0x15d   : > { %v1461_v44 = vadd.s32 %v3063_v62, %v3069_v1  ;;  %v1309_v63 = vor.u32 8388608, %v3094_v28  ;;  %v1313_v48 = vsel %vm1312_vm7, %v1311_v24, 0  ;;  %v3169_v3 = vand.u32 3, %v666_v23 }
 0x15e   : > { %v652_v61 = vor.u32 4788187, %v651_v47  ;;  %vm2304_vm8 = vcmp.lt.s32.totalorder %v2303_v17, 0  ;;  %v508_v19 = vsel %vm502_vm3, %v505_v18, %v507_v45  ;;  %v1315_v6 = vand.u32 31, %v1313_v48 }
 0x15f   : > { %v655_v13 = vcvt.s32.f32 %v648_v46  ;;  %v1476_v14 = vsel %vm2304_vm8, 0, %v2303_v17  ;;  %vm526_vm9 = vc.u32 %v3157_v58, %v3160_v59  ;;  %v3178_v1 = vsel %vm1407_vm6, %v1491_v11, %v3113_v43 }
 0x160   : > { %v653_v7 = vand.u32 2147483647, %v652_v61  ;;  %v1477_v26 = vsub.s32 32, %v1476_v14  ;;  %v1481_v62 = vsub.s32 4294967266, %v1476_v14  ;;  %v527_v28 = vadd.s32 1, %v3161_v60 }
 0x161   : > { %v524_v39 = vmul.u32 %v3097_v32, %v508_v19  ;;  %v3182_v12 = vshrl.u32 %v1313_v48, 5  ;;  %v1316_v54 = vsub.s32 32, %v1315_v6  ;;  %v1478_v30 = vshll.u32 %v3123_v4, %v1476_v14 }
 0x162   : > { %v656_v23 = vmul.f32 %v655_v13, %v653_v7  ;;  %v1479_v20 = vshrl.u32 %v1461_v44, %v1477_v26  ;;  %v1482_v33 = vadd.s32 127, %v1481_v62  ;;  %v528_v34 = vsel %vm526_vm9, %v527_v28, %v3161_v60 }
 0x163   : > { %v529_v36 = vadd.s32 %v528_v34, %v524_v39  ;;  %v1318_v37 = vshll.u32 %v2728_v21, %v1315_v6  ;;  %v1319_v43 = vshrl.u32 %v2729_v25, %v1316_v54  ;;  %v1321_v42 = vshll.u32 %v2729_v25, %v1315_v6 }
 0x164   : > { %v657_v35 = vxor.u32 2147483648, %v656_v23  ;;  %v1480_v40 = vor.u32 %v1479_v20, %v1478_v30  ;;  %v1483_v16 = vshll.u32 %v1482_v33, 23  ;;  %v1322_v32 = vshrl.u32 %v2730_v27, %v1316_v54 }
 0x165   : > { %v530_v4 = vadd.s32 536870912, %v529_v36  ;;  %v1324_v9 = vshll.u32 %v2730_v27, %v1315_v6  ;;  %v1325_v11 = vshrl.u32 %v2731_v29, %v1316_v54  ;;  %v1320_v46 = vor.u32 %v1319_v43, %v1318_v37 }
 0x166   : > { %v658_v24 = vsel %vm575_vm15, %v657_v35, %v656_v23  ;;  %v1484_v45 = vor.u32 4788187, %v1483_v16  ;;  %v1327_v47 = vshll.u32 %v2731_v29, %v1315_v6  ;;  %v1487_v55 = vcvt.s32.f32 %v1480_v40 }
 0x167   : > { %v661_v18 = vsel %vm3081_vm14, %v2969_v49, %v658_v24  ;;  %v3198_v17 = vshrl.u32 %v530_v4, 30  ;;  %v1328_v60 = vshrl.u32 %v2732_v31, %v1316_v54  ;;  %v1323_v44 = vor.u32 %v1322_v32, %v1321_v42 }
 0x168   : > { %2598 = vcosq.f32 %v661_v18  ;;  %v1485_v61 = vand.u32 2147483647, %v1484_v45  ;;  %v1331_v48 = vshrl.u32 %v2733_v38, %v1316_v54  ;;  %vm3205_vm10 = vcmp.le.f32.partialorder %v1405_v57, 0.7853982 }
 0x169   : > { %2600 = vsinq.f32 %v661_v18  ;;  %v532_v19 = vshll.u32 %v3198_v17, 30  ;;  %v1329_v7 = vor.u32 %v1328_v60, %v1327_v47  ;;  %v1326_v14 = vor.u32 %v1325_v11, %v1324_v9 }
 0x16a   : > { %v1488_v13 = vmul.f32 %v1487_v55, %v1485_v61  ;;  %v1330_v26 = vshll.u32 %v2732_v31, %v1315_v6  ;;  %vm672_vm11 = vcmp.eq.s32.totalorder %v3169_v3, 2  ;;  %v1494_v62 = vsel %vm3205_vm10, 0, %v3178_v1 }
 0x16b   : > { %v3214_v28 = vsub.s32 %v529_v36, %v532_v19  ;;  %vm1333_vm12 = vcmp.lt.s32.totalorder %v3182_v12, 1  ;;  %v3217_v23 = vshll.u32 %v1309_v63, 8  ;;  %vm669_vm13 = vcmp.eq.s32.totalorder %v3169_v3, 0 }
 0x16c   : > { %v1489_v57 = vxor.u32 2147483648, %v1488_v13  ;;  %v1332_v39 = vor.u32 %v1331_v48, %v1330_v26  ;;  %vm1336_vm14 = vcmp.lt.s32.totalorder %v3182_v12, 4  ;;  %v1341_v6 = vsel %vm1333_vm12, %v1320_v46, %v1323_v44 }
 0x16d   : > { %vm668_vm15 = vcmp.lt.s32.totalorder %v3169_v3, 2  ;;  %v535_v1 = vsub.s32 0, %v3214_v28  ;;  %v1317_v30 = vshrl.u32 %v2728_v21, %v1316_v54  ;;  %vm1335_vm0 = vcmp.lt.s32.totalorder %v3182_v12, 3 }
 0x16e   : > { %v1342_v63 = vsel %vm1336_vm14, %v1329_v7, 920167782  ;;  %vm665_vm1 = vweird.f32 %v2969_v49  ;;  %v1490_v20 = vsel %vm1407_vm6, %v1489_v57, %v1488_v13  ;;  %vm471_vm2 = vcmp.lt.s32.totalorder %v2973_v51, 0  ;;  %v3275_v13 = vpop.f32.mrb[5].mxu0 }
 0x16f   : > { %vm1334_vm3 = vcmp.lt.s32.totalorder %v3182_v12, 2  ;;  %v1338_v33 = vsel %vm1336_vm14, %v1326_v14, 2102212464  ;;  %v1343_v54 = vsel %vm1335_vm0, %v1326_v14, %v1342_v63  ;;  %v1493_v34 = vsel %vm3205_vm10, %v2971_v50, %v1490_v20 }
 0x170   : > { %v2266_v35 = vmin.u32 %v535_v1, %v3214_v28  ;;  %v1344_v36 = vsel %vm1334_vm3, %v1341_v6, %v1343_v54  ;;  %v1345_v37 = vsel %vm1333_vm12, %v1323_v44, %v1326_v14  ;;  %2602 = vcosq.f32 %v1493_v34 }
 0x171   : > { %v1346_v43 = vsel %vm1336_vm14, %v1332_v39, 1326507024  ;;  %v3250_v40 = vmul.u32.u64.low %v3217_v23, %v1344_v36  ;;  %v3251_v16 = vmul.u32.u64.high %v3217_v23, %v1344_v36, %v3250_v40  ;;  %2604 = vsinq.f32 %v1493_v34 }
 0x172   : > { %v2599_v42 = vpop.eup %2598  ;;  %v537_v32 = vclz %v2266_v35  ;;  %v1337_v24 = vsel %vm1333_vm12, %v1317_v30, %v1320_v46  ;;  %v1339_v4 = vsel %vm1335_vm0, %v1323_v44, %v1338_v33  ;;  %v1498_v18 = vadd.s32 3, %v1494_v62 }
 0x173   : > { %v2601_v9 = vpop.eup %2600  ;;  %v673_v11 = vxor.u32 2147483648, %v2599_v42  ;;  %v555_v45 = vsub.s32 4, %v3198_v17  ;;  %v1347_v47 = vsel %vm1335_vm0, %v1329_v7, %v1346_v43  ;;  %v390_v46 = vadd.f32 %v2975_v52, %v2964_v41 }
 0x174   : > { %v670_v55 = vxor.u32 2147483648, %v2601_v9  ;;  %v2267_v60 = vadd.s32 4294967294, %v537_v32  ;;  %v1348_v61 = vsel %vm1334_vm3, %v1345_v37, %v1347_v47  ;;  %v1340_v48 = vsel %vm1334_vm3, %v1337_v24, %v1339_v4 }
 0x175   : > { %v674_v44 = vsel %vm672_vm11, %v673_v11, %v2601_v9  ;;  %v3272_v19 = vmul.u32.u64.low %v3217_v23, %v1348_v61  ;;  %v3273_v22 = vmul.u32.u64.high %v3217_v23, %v1348_v61, %v3272_v19  ;;  %v1359_v14 = vadd.s32 1, %v3251_v16 }
 0x176   : > { %v671_v7 = vsel %vm669_vm13, %v2599_v42, %v670_v55  ;;  %vm2268_vm4 = vcmp.lt.s32.totalorder %v2267_v60, 0  ;;  %v3280_v26 = vmul.f32 30.0, %v390_v46  ;;  %v1499_v62 = vand.u32 3, %v1498_v18 }
 0x177   : > { %v675_v52 = vsel %vm668_vm15, %v671_v7, %v674_v44  ;;  %v525_v12 = vadd.s32 %v3160_v59, %v3157_v58  ;;  %v540_v57 = vsel %vm2268_vm4, 0, %v2267_v60  ;;  %vm1497_vm5 = vweird.f32 %v2971_v50 }
 0x178   : > { %v676_v39 = vsel %vm665_vm1, nan, %v675_v52  ;;  %v541_v6 = vsub.s32 32, %v540_v57  ;;  %v545_v1 = vsub.s32 4294967266, %v540_v57  ;;  %v556_v30 = vsel %vm471_vm2, %v555_v45, %v3198_v17 }
 0x179   : > { %2134 = vst [vmem:[%s3292_s29 + $0x8] sm:$0xff] %v676_v39  ;;  %v542_v3 = vshll.u32 %v3214_v28, %v540_v57  ;;  %v1356_v58 = vmul.u32 %v3217_v23, %v1340_v48  ;;  %vm1358_vm6 = vc.u32 %v3273_v22, %v3250_v40  ;;  %v781_v49 = vand.u32 2147483647, %v3280_v26 }
 0x17a   : > { %v543_v59 = vshrl.u32 %v525_v12, %v541_v6  ;;  %v546_v63 = vadd.s32 127, %v545_v1  ;;  %v1360_v20 = vsel %vm1358_vm6, %v1359_v14, %v3251_v16  ;;  %v784_v33 = vand.u32 2139095040, %v3280_v26  ;;  %v2603_v17 = vpop.eup %2602 }
 0x17b   : > { %vm1501_vm7 = vcmp.eq.s32.totalorder %v1499_v62, 0  ;;  %vm3304_vm8 = vcmp.le.f32.partialorder %v469_v8, 0.7853982  ;;  %v1361_v28 = vadd.s32 %v1360_v20, %v1356_v58  ;;  %v430_v23 = vadd.f32 %v2977_v53, %v2964_v41  ;;  %v2605_v34 = vpop.eup %2604 }
 0x17c   : > { %v1505_v35 = vxor.u32 2147483648, %v2603_v17  ;;  %v544_v36 = vor.u32 %v543_v59, %v542_v3  ;;  %v547_v37 = vshll.u32 %v546_v63, 23  ;;  %v785_v43 = vshrl.u32 %v784_v33, 23 }
 0x17d   : > { %v1502_v16 = vxor.u32 2147483648, %v2605_v34  ;;  %vm1504_vm9 = vcmp.eq.s32.totalorder %v1499_v62, 2  ;;  %v558_v42 = vsel %vm3304_vm8, 0, %v556_v30  ;;  %v1362_v32 = vadd.s32 536870912, %v1361_v28 }
 0x17e   : > { %v1506_v24 = vsel %vm1504_vm9, %v1505_v35, %v2605_v34  ;;  %v548_v8 = vor.u32 4788187, %v547_v37  ;;  %v2277_v4 = vadd.s32 4294967169, %v785_v43  ;;  %v788_v9 = vand.u32 8388607, %v781_v49 }
 0x17f   : > { %vm1500_vm10 = vcmp.lt.s32.totalorder %v1499_v62, 2  ;;  %v1503_v53 = vsel %vm1501_vm7, %v2603_v17, %v1502_v16  ;;  %v1363_v11 = vshrl.u32 %v1362_v32, 30  ;;  %v3315_v18 = vmul.f32 30.0, %v430_v23 }
 0x180   : > { %v1507_v45 = vsel %vm1500_vm10, %v1503_v53, %v1506_v24  ;;  %v549_v47 = vand.u32 2147483647, %v548_v8  ;;  %v551_v55 = vcvt.s32.f32 %v544_v36  ;;  %v791_v60 = vadd.s32 1, %v2277_v4 }
 0x181   : > { %v1508_v61 = vsel %vm1497_vm5, nan, %v1507_v45  ;;  %v562_v46 = vadd.s32 3, %v558_v42  ;;  %v1364_v44 = vshll.u32 %v1363_v11, 30  ;;  %v1387_v48 = vsub.s32 4, %v1363_v11 }
 0x182   : > { %2142 = vst [vmem:[%s3292_s29 + $0x48] sm:$0xff] %v1508_v61  ;;  %v552_v19 = vmul.f32 %v551_v55, %v549_v47  ;;  %vm1303_vm11 = vcmp.lt.s32.totalorder %v2994_v15, 0  ;;  %v789_v7 = vor.u32 8388608, %v788_v9  ;;  %vm792_vm12 = vcmp.gt.s32.totalorder %v791_v60, 0 }
 0x183   : > { %v3321_v14 = vsub.s32 %v1361_v28, %v1364_v44  ;;  %v1388_v52 = vsel %vm1303_vm11, %v1387_v48, %v1363_v11  ;;  %v793_v62 = vsel %vm792_vm12, %v791_v60, 0  ;;  %v1613_v12 = vand.u32 2147483647, %v3315_v18 }
 0x184   : > { %v553_v57 = vxor.u32 2147483648, %v552_v19  ;;  %vm3328_vm13 = vcmp.le.f32.partialorder %v1301_v5, 0.7853982  ;;  %v795_v39 = vand.u32 31, %v793_v62  ;;  %v3332_v6 = vand.u32 3, %v562_v46 }
 0x185   : > { %v1367_v1 = vsub.s32 0, %v3321_v14  ;;  %v1390_v30 = vsel %vm3328_vm13, 0, %v1388_v52  ;;  %v1616_v3 = vand.u32 2139095040, %v3315_v18  ;;  %v1357_v59 = vadd.s32 %v3250_v40, %v3273_v22 }
 0x186   : > { %v554_v58 = vsel %vm471_vm2, %v553_v57, %v552_v19  ;;  %v796_v5 = vsub.s32 32, %v795_v39  ;;  %v3342_v63 = vshll.u32 %v789_v7, 8  ;;  %v3348_v17 = vshrl.u32 %v793_v62, 5 }
 0x187   : > { %v557_v20 = vsel %vm3304_vm8, %v2973_v51, %v554_v58  ;;  %v2298_v33 = vmin.u32 %v1367_v1, %v3321_v14  ;;  %v3352_v28 = vand.u32 8388607, %v1613_v12  ;;  %v3354_v23 = vadd.s32 3, %v1390_v30 }
 0x188   : > { %2606 = vcosq.f32 %v557_v20  ;;  %v799_v40 = vshrl.u32 %v2729_v25, %v796_v5  ;;  %v802_v22 = vshrl.u32 %v2730_v27, %v796_v5  ;;  %v798_v54 = vshll.u32 %v2728_v21, %v795_v39 }
 0x189   : > { %2608 = vsinq.f32 %v557_v20  ;;  %v1369_v34 = vclz %v2298_v33  ;;  %v1617_v35 = vshrl.u32 %v1616_v3, 23  ;;  %v797_v36 = vshrl.u32 %v2728_v21, %v796_v5 }
 0x18a   : > { %v801_v37 = vshll.u32 %v2729_v25, %v795_v39  ;;  %v804_v43 = vshll.u32 %v2730_v27, %v795_v39  ;;  %v805_v16 = vshrl.u32 %v2731_v29, %v796_v5  ;;  %v800_v32 = vor.u32 %v799_v40, %v798_v54 }
 0x18b   : > { %v2299_v42 = vadd.s32 4294967294, %v1369_v34  ;;  %v807_v24 = vshll.u32 %v2731_v29, %v795_v39  ;;  %v808_v8 = vshrl.u32 %v2732_v31, %v796_v5  ;;  %vm568_vm14 = vcmp.eq.s32.totalorder %v3332_v6, 2  ;;  %v3386_v34 = vpop.f32.mrb[5].mxu1 }
 0x18c   : > { %v803_v4 = vor.u32 %v802_v22, %v801_v37  ;;  %v806_v9 = vor.u32 %v805_v16, %v804_v43  ;;  %v810_v53 = vshll.u32 %v2732_v31, %v795_v39  ;;  %v811_v11 = vshrl.u32 %v2733_v38, %v796_v5 }
 0x18d   : > { %vm565_vm15 = vcmp.eq.s32.totalorder %v3332_v6, 0  ;;  %vm2300_vm0 = vcmp.lt.s32.totalorder %v2299_v42, 0  ;;  %v809_v45 = vor.u32 %v808_v8, %v807_v24  ;;  %vm813_vm1 = vcmp.lt.s32.totalorder %v3348_v17, 1 }
 0x18e   : > { %vm814_vm2 = vcmp.lt.s32.totalorder %v3348_v17, 2  ;;  %vm564_vm3 = vcmp.lt.s32.totalorder %v3332_v6, 2  ;;  %v1372_v47 = vsel %vm2300_vm0, 0, %v2299_v42  ;;  %v812_v55 = vor.u32 %v811_v11, %v810_v53 }
 0x18f   : > { %vm815_vm4 = vcmp.lt.s32.totalorder %v3348_v17, 3  ;;  %vm816_vm5 = vcmp.lt.s32.totalorder %v3348_v17, 4  ;;  %vm561_vm6 = vweird.f32 %v2973_v51  ;;  %v1373_v60 = vsub.s32 32, %v1372_v47 }
 0x190   : > { %v1377_v61 = vsub.s32 4294967266, %v1372_v47  ;;  %v817_v46 = vsel %vm813_vm1, %v797_v36, %v800_v32  ;;  %v818_v44 = vsel %vm816_vm5, %v806_v9, 2102212464  ;;  %v1374_v48 = vshll.u32 %v3321_v14, %v1372_v47 }
 0x191   : > { %v821_v19 = vsel %vm813_vm1, %v800_v32, %v803_v4  ;;  %v822_v7 = vsel %vm816_vm5, %v809_v45, 920167782  ;;  %v825_v52 = vsel %vm813_vm1, %v803_v4, %v806_v9  ;;  %v1375_v62 = vshrl.u32 %v1357_v59, %v1373_v60 }
 0x192   : > { %v1378_v57 = vadd.s32 127, %v1377_v61  ;;  %v823_v39 = vsel %vm815_vm4, %v806_v9, %v822_v7  ;;  %v826_v1 = vsel %vm816_vm5, %v812_v55, 1326507024  ;;  %v2607_v30 = vpop.eup %2606  ;;  %v819_v3 = vsel %vm815_vm4, %v803_v4, %v818_v44 }
 0x193   : > { %v824_v58 = vsel %vm814_vm2, %v821_v19, %v823_v39  ;;  %v827_v5 = vsel %vm815_vm4, %v809_v45, %v826_v1  ;;  %v2309_v14 = vadd.s32 4294967169, %v1617_v35  ;;  %v2609_v20 = vpop.eup %2608  ;;  %v569_v33 = vxor.u32 2147483648, %v2607_v30 }
 0x194   : > { %v1376_v40 = vor.u32 %v1375_v62, %v1374_v48  ;;  %v1379_v59 = vshll.u32 %v1378_v57, 23  ;;  %v828_v22 = vsel %vm814_vm2, %v825_v52, %v827_v5  ;;  %v566_v54 = vxor.u32 2147483648, %v2609_v20 }
 0x195   : > { %v3389_v36 = vmul.u32.u64.low %v3342_v63, %v828_v22  ;;  %v3390_v37 = vmul.u32.u64.high %v3342_v63, %v828_v22, %v3389_v36  ;;  %v1623_v43 = vadd.s32 1, %v2309_v14  ;;  %v570_v16 = vsel %vm568_vm14, %v569_v33, %v2609_v20 }
 0x196   : > { %v1380_v35 = vor.u32 4788187, %v1379_v59  ;;  %v820_v42 = vsel %vm814_vm2, %v817_v46, %v819_v3  ;;  %v1621_v32 = vor.u32 8388608, %v3352_v28  ;;  %v567_v24 = vsel %vm565_vm15, %v2607_v30, %v566_v54 }
 0x197   : > { %v3400_v8 = vmul.u32.u64.low %v3342_v63, %v824_v58  ;;  %v3401_v4 = vmul.u32.u64.high %v3342_v63, %v824_v58, %v3400_v8  ;;  %vm1624_vm7 = vcmp.gt.s32.totalorder %v1623_v43, 0  ;;  %v571_v9 = vsel %vm564_vm3, %v567_v24, %v570_v16 }
 0x198   : > { %v1381_v53 = vand.u32 2147483647, %v1380_v35  ;;  %v1383_v11 = vcvt.s32.f32 %v1376_v40  ;;  %v1625_v45 = vsel %vm1624_vm7, %v1623_v43, 0  ;;  %v572_v17 = vsel %vm561_vm6, nan, %v571_v9 }
 0x199   : > { %v3408_v47 = vshrl.u32 %v1625_v45, 5  ;;  %2133 = vst [vmem:[%s3292_s29] sm:$0xff] %v572_v17  ;;  %vm838_vm8 = vc.u32 %v3390_v37, %v3400_v8  ;;  %v1627_v55 = vand.u32 31, %v1625_v45  ;;  %v385_v60 = vadd.f32 %v2964_v41, %v2981_v56 }
 0x19a   : > { %v1384_v28 = vmul.f32 %v1383_v11, %v1381_v53  ;;  %v3416_v6 = vand.u32 3, %v3354_v23  ;;  %v836_v61 = vmul.u32 %v3342_v63, %v820_v42  ;;  %v839_v46 = vadd.s32 1, %v3401_v4 }
 0x19b   : > { %v3420_v51 = vshll.u32 %v1621_v32, 8  ;;  %v1628_v48 = vsub.s32 32, %v1627_v55  ;;  %v1630_v19 = vshll.u32 %v2728_v21, %v1627_v55  ;;  %vm1645_vm9 = vcmp.lt.s32.totalorder %v3408_v47, 1 }
 0x19c   : > { %v1385_v44 = vxor.u32 2147483648, %v1384_v28  ;;  %v840_v7 = vsel %vm838_vm8, %v839_v46, %v3401_v4  ;;  %v1633_v52 = vshll.u32 %v2729_v25, %v1627_v55  ;;  %v1636_v41 = vshll.u32 %v2730_v27, %v1627_v55 }
 0x19d   : > { %v1639_v56 = vshll.u32 %v2731_v29, %v1627_v55  ;;  %v841_v23 = vadd.s32 %v840_v7, %v836_v61  ;;  %v1631_v62 = vshrl.u32 %v2729_v25, %v1628_v48  ;;  %v1642_v57 = vshll.u32 %v2732_v31, %v1627_v55 }
 0x19e   : > { %v1386_v63 = vsel %vm1303_vm11, %v1385_v44, %v1384_v28  ;;  %v1634_v1 = vshrl.u32 %v2730_v27, %v1628_v48  ;;  %v1637_v30 = vshrl.u32 %v2731_v29, %v1628_v48  ;;  %v1640_v3 = vshrl.u32 %v2732_v31, %v1628_v48 }
 0x19f   : > { %v1389_v39 = vsel %vm3328_vm13, %v2994_v15, %v1386_v63  ;;  %v842_v58 = vadd.s32 536870912, %v841_v23  ;;  %v1632_v5 = vor.u32 %v1631_v62, %v1630_v19  ;;  %v1643_v14 = vshrl.u32 %v2733_v38, %v1628_v48 }
 0x1a0   : > { %2610 = vcosq.f32 %v1389_v39  ;;  %v1635_v20 = vor.u32 %v1634_v1, %v1633_v52  ;;  %v1638_v33 = vor.u32 %v1637_v30, %v1636_v41  ;;  %v1641_v40 = vor.u32 %v1640_v3, %v1639_v56  ;;  %v3499_v3 = vpop.f32.mrb[6].mxu0 }
 0x1a1   : > { %2612 = vsinq.f32 %v1389_v39  ;;  %v843_v59 = vshrl.u32 %v842_v58, 30  ;;  %v1644_v22 = vor.u32 %v1643_v14, %v1642_v57  ;;  %vm1647_vm10 = vcmp.lt.s32.totalorder %v3408_v47, 3 }
 0x1a2   : > { %vm1648_vm11 = vcmp.lt.s32.totalorder %v3408_v47, 4  ;;  %v1629_v50 = vshrl.u32 %v2728_v21, %v1628_v48  ;;  %v1653_v36 = vsel %vm1645_vm9, %v1632_v5, %v1635_v20  ;;  %vm1646_vm12 = vcmp.lt.s32.totalorder %v3408_v47, 2  ;;  %v3476_v48 = vld [vmem:[%s4360_s2] ss:$0 sm:$0xff] }
 0x1a3   : > { %v1650_v54 = vsel %vm1648_vm11, %v1638_v33, 2102212464  ;;  %v1654_v43 = vsel %vm1648_vm11, %v1641_v40, 920167782  ;;  %v844_v16 = vshll.u32 %v843_v59, 30  ;;  %v1657_v42 = vsel %vm1645_vm9, %v1635_v20, %v1638_v33 }
 0x1a4   : > { %v1655_v35 = vsel %vm1647_vm10, %v1638_v33, %v1654_v43  ;;  %v1649_v32 = vsel %vm1645_vm9, %v1629_v50, %v1632_v5  ;;  %v1658_v4 = vsel %vm1648_vm11, %v1644_v22, 1326507024  ;;  %v3453_v9 = vmul.f32 30.0, %v385_v60 }
 0x1a5   : > { %v1656_v24 = vsel %vm1646_vm12, %v1653_v36, %v1655_v35  ;;  %v3455_v53 = vsub.s32 %v841_v23, %v844_v16  ;;  %v867_v11 = vsub.s32 4, %v843_v59  ;;  %v1651_v45 = vsel %vm1647_vm10, %v1635_v20, %v1650_v54 }
 0x1a6   : > { %v1659_v17 = vsel %vm1647_vm10, %v1641_v40, %v1658_v4  ;;  %v3464_v55 = vmul.u32.u64.low %v3420_v51, %v1656_v24  ;;  %v3465_v61 = vmul.u32.u64.high %v3420_v51, %v1656_v24, %v3464_v55  ;;  %v425_v19 = vadd.f32 %v3476_v48, %v2992_v10 }
 0x1a7   : > { %v1660_v28 = vsel %vm1646_vm12, %v1657_v42, %v1659_v17  ;;  %v847_v60 = vsub.s32 0, %v3455_v53  ;;  %vm783_vm13 = vcmp.lt.s32.totalorder %v3280_v26, 0  ;;  %v1652_v7 = vsel %vm1646_vm12, %v1649_v32, %v1651_v45 }
 0x1a8   : > { %v3470_v46 = vmul.u32.u64.low %v3420_v51, %v1660_v28  ;;  %v3471_v44 = vmul.u32.u64.high %v3420_v51, %v1660_v28, %v3470_v46  ;;  %v677_v52 = vand.u32 2147483647, %v3453_v9  ;;  %v680_v41 = vand.u32 2139095040, %v3453_v9 }
 0x1a9   : > { %vm1396_vm14 = vcmp.lt.s32.totalorder %v3416_v6, 2  ;;  %vm3488_vm15 = vcmp.le.f32.partialorder %v781_v49, 0.7853982  ;;  %v2278_v10 = vmin.u32 %v847_v60, %v3455_v53  ;;  %v868_v23 = vsel %vm783_vm13, %v867_v11, %v843_v59 }
 0x1aa   : > { %v2611_v56 = vpop.eup %2610  ;;  %vm1397_vm0 = vcmp.eq.s32.totalorder %v3416_v6, 0  ;;  %v1671_v57 = vadd.s32 1, %v3465_v61  ;;  %v681_v39 = vshrl.u32 %v680_v41, 23  ;;  %vm1400_vm1 = vcmp.eq.s32.totalorder %v3416_v6, 2 }
 0x1ab   : > { %v2613_v47 = vpop.eup %2612  ;;  %v1401_v62 = vxor.u32 2147483648, %v2611_v56  ;;  %v849_v30 = vclz %v2278_v10  ;;  %v1668_v49 = vmul.u32 %v3420_v51, %v1652_v7  ;;  %v870_v5 = vsel %vm3488_vm15, 0, %v868_v23 }
 0x1ac   : > { %v1398_v1 = vxor.u32 2147483648, %v2613_v47  ;;  %vm1670_vm2 = vc.u32 %v3471_v44, %v3464_v55  ;;  %v684_v14 = vand.u32 8388607, %v677_v52  ;;  %v2273_v59 = vadd.s32 4294967169, %v681_v39 }
 0x1ad   : > { %v1402_v58 = vsel %vm1400_vm1, %v1401_v62, %v2613_v47  ;;  %v2279_v33 = vadd.s32 4294967294, %v849_v30  ;;  %v1672_v40 = vsel %vm1670_vm2, %v1671_v57, %v3465_v61  ;;  %vm1393_vm3 = vweird.f32 %v2994_v15 }
 0x1ae   : > { %v1399_v20 = vsel %vm1397_vm0, %v2611_v56, %v1398_v1  ;;  %v1673_v22 = vadd.s32 %v1672_v40, %v1668_v49  ;;  %v3511_v50 = vmul.f32 30.0, %v425_v19  ;;  %v687_v36 = vadd.s32 1, %v2273_v59 }
 0x1af   : > { %v1403_v51 = vsel %vm1396_vm14, %v1399_v20, %v1402_v58  ;;  %vm2280_vm4 = vcmp.lt.s32.totalorder %v2279_v33, 0  ;;  %v837_v43 = vadd.s32 %v3400_v8, %v3390_v37  ;;  %v874_v35 = vadd.s32 3, %v870_v5 }
 0x1b0   : > { %v1404_v54 = vsel %vm1393_vm3, nan, %v1403_v51  ;;  %v852_v16 = vsel %vm2280_vm4, 0, %v2279_v33  ;;  %v1674_v42 = vadd.s32 536870912, %v1673_v22  ;;  %v685_v4 = vor.u32 8388608, %v684_v14 }
 0x1b1   : > { %2141 = vst [vmem:[%s3292_s29 + $0x40] sm:$0xff] %v1404_v54  ;;  %v853_v32 = vsub.s32 32, %v852_v16  ;;  %v857_v24 = vsub.s32 4294967266, %v852_v16  ;;  %vm688_vm5 = vcmp.gt.s32.totalorder %v687_v36, 0  ;;  %v1509_v11 = vand.u32 2147483647, %v3511_v50 }
 0x1b2   : > { %v3516_v15 = vshrl.u32 %v1674_v42, 30  ;;  %v689_v6 = vsel %vm688_vm5, %v687_v36, 0  ;;  %v1512_v45 = vand.u32 2139095040, %v3511_v50  ;;  %v854_v17 = vshll.u32 %v3455_v53, %v852_v16 }
 0x1b3   : > { %v855_v28 = vshrl.u32 %v837_v43, %v853_v32  ;;  %v858_v61 = vadd.s32 127, %v857_v24  ;;  %v691_v60 = vand.u32 31, %v689_v6  ;;  %v3522_v7 = vand.u32 3, %v874_v35 }
 0x1b4   : > { %v1676_v37 = vshll.u32 %v3516_v15, 30  ;;  %v1669_v41 = vadd.s32 %v3464_v55, %v3471_v44  ;;  %v3528_v10 = vshll.u32 %v685_v4, 8  ;;  %v3530_v47 = vshrl.u32 %v689_v6, 5  ;;  %v3554_v6 = vpop.f32.mrb[6].mxu1 }
 0x1b5   : > { %v856_v8 = vor.u32 %v855_v28, %v854_v17  ;;  %v859_v46 = vshll.u32 %v858_v61, 23  ;;  %v692_v19 = vsub.s32 32, %v691_v60  ;;  %v1513_v53 = vshrl.u32 %v1512_v45, 23 }
 0x1b6   : > { %v3526_v56 = vsub.s32 %v1673_v22, %v1676_v37  ;;  %v3534_v62 = vand.u32 8388607, %v1509_v11  ;;  %v700_v55 = vshll.u32 %v2730_v27, %v691_v60  ;;  %v694_v14 = vshll.u32 %v2728_v21, %v691_v60 }
 0x1b7   : > { %v860_v23 = vor.u32 4788187, %v859_v46  ;;  %v695_v39 = vshrl.u32 %v2729_v25, %v692_v19  ;;  %v698_v1 = vshrl.u32 %v2730_v27, %v692_v19  ;;  %v863_v30 = vcvt.s32.f32 %v856_v8 }
 0x1b8   : > { %v1679_v57 = vsub.s32 0, %v3526_v56  ;;  %v701_v49 = vshrl.u32 %v2731_v29, %v692_v19  ;;  %v704_v58 = vshrl.u32 %v2732_v31, %v692_v19  ;;  %v697_v20 = vshll.u32 %v2729_v25, %v691_v60 }
 0x1b9   : > { %v861_v44 = vand.u32 2147483647, %v860_v23  ;;  %v703_v33 = vshll.u32 %v2731_v29, %v691_v60  ;;  %v1699_v59 = vsub.s32 4, %v3516_v15  ;;  %v2305_v22 = vadd.s32 4294967169, %v1513_v53 }
 0x1ba   : > { %v2310_v5 = vmin.u32 %v1679_v57, %v3526_v56  ;;  %v702_v51 = vor.u32 %v701_v49, %v700_v55  ;;  %vm1615_vm6 = vcmp.lt.s32.totalorder %v3315_v18, 0  ;;  %v696_v36 = vor.u32 %v695_v39, %v694_v14 }
 0x1bb   : > { %v864_v40 = vmul.f32 %v863_v30, %v861_v44  ;;  %v699_v43 = vor.u32 %v698_v1, %v697_v20  ;;  %v705_v16 = vor.u32 %v704_v58, %v703_v33  ;;  %v693_v42 = vshrl.u32 %v2728_v21, %v692_v19 }
 0x1bc   : > { %v1681_v54 = vclz %v2310_v5  ;;  %v706_v32 = vshll.u32 %v2732_v31, %v691_v60  ;;  %v707_v24 = vshrl.u32 %v2733_v38, %v692_v19  ;;  %vm709_vm7 = vcmp.lt.s32.totalorder %v3530_v47, 1 }
 0x1bd   : > { %v865_v35 = vxor.u32 2147483648, %v864_v40  ;;  %vm710_vm8 = vcmp.lt.s32.totalorder %v3530_v47, 2  ;;  %vm712_vm9 = vcmp.lt.s32.totalorder %v3530_v47, 4  ;;  %vm711_vm10 = vcmp.lt.s32.totalorder %v3530_v47, 3 }
 0x1be   : > { %v2311_v4 = vadd.s32 4294967294, %v1681_v54  ;;  %v708_v17 = vor.u32 %v707_v24, %v706_v32  ;;  %v714_v28 = vsel %vm712_vm9, %v702_v51, 2102212464  ;;  %v717_v60 = vsel %vm709_vm7, %v696_v36, %v699_v43 }
 0x1bf   : > { %v866_v45 = vsel %vm783_vm13, %v865_v35, %v864_v40  ;;  %v718_v37 = vsel %vm712_vm9, %v705_v16, 920167782  ;;  %v713_v46 = vsel %vm709_vm7, %v693_v42, %v696_v36  ;;  %v715_v63 = vsel %vm711_vm10, %v699_v43, %v714_v28 }
 0x1c0   : > { %v869_v61 = vsel %vm3488_vm15, %v3280_v26, %v866_v45  ;;  %vm2312_vm11 = vcmp.lt.s32.totalorder %v2311_v4, 0  ;;  %v719_v19 = vsel %vm711_vm10, %v702_v51, %v718_v37  ;;  %v721_v1 = vsel %vm709_vm7, %v699_v43, %v702_v51 }
 0x1c1   : > { %2614 = vcosq.f32 %v869_v61  ;;  %v1684_v8 = vsel %vm2312_vm11, 0, %v2311_v4  ;;  %v720_v39 = vsel %vm710_vm8, %v717_v60, %v719_v19  ;;  %v722_v55 = vsel %vm712_vm9, %v708_v17, 1326507024 }
 0x1c2   : > { %2616 = vsinq.f32 %v869_v61  ;;  %v1685_v23 = vsub.s32 32, %v1684_v8  ;;  %v1689_v53 = vsub.s32 4294967266, %v1684_v8  ;;  %v1686_v57 = vshll.u32 %v3526_v56, %v1684_v8 }
 0x1c3   : > { %v723_v49 = vsel %vm711_vm10, %v705_v16, %v722_v55  ;;  %v1519_v58 = vadd.s32 1, %v2305_v22  ;;  %v1700_v5 = vsel %vm1615_vm6, %v1699_v59, %v3516_v15  ;;  %vm876_vm12 = vcmp.lt.s32.totalorder %v3522_v7, 2 }
 0x1c4   : > { %v1687_v44 = vshrl.u32 %v1669_v41, %v1685_v23  ;;  %v1690_v30 = vadd.s32 127, %v1689_v53  ;;  %v724_v56 = vsel %vm710_vm8, %v721_v1, %v723_v49  ;;  %vm3600_vm13 = vcmp.le.f32.partialorder %v1613_v12, 0.7853982 }
 0x1c5   : > { %v3589_v14 = vmul.u32.u64.low %v3528_v10, %v720_v39  ;;  %v3590_v20 = vmul.u32.u64.high %v3528_v10, %v720_v39, %v3589_v14  ;;  %v3594_v41 = vmul.u32.u64.low %v3528_v10, %v724_v56  ;;  %v3595_v51 = vmul.u32.u64.high %v3528_v10, %v724_v56, %v3594_v41 }
 0x1c6   : > { %v1688_v33 = vor.u32 %v1687_v44, %v1686_v57  ;;  %v1691_v40 = vshll.u32 %v1690_v30, 23  ;;  %v716_v59 = vsel %vm710_vm8, %v713_v46, %v715_v63  ;;  %vm1520_vm14 = vcmp.gt.s32.totalorder %v1519_v58, 0 }
 0x1c7   : > { %vm873_vm15 = vweird.f32 %v3280_v26  ;;  %vm877_vm0 = vcmp.eq.s32.totalorder %v3522_v7, 0  ;;  %v1702_v54 = vsel %vm3600_vm13, 0, %v1700_v5  ;;  %v1521_v36 = vsel %vm1520_vm14, %v1519_v58, 0 }
 0x1c8   : > { %v1692_v22 = vor.u32 4788187, %v1691_v40  ;;  %vm880_vm1 = vcmp.eq.s32.totalorder %v3522_v7, 2  ;;  %v735_v12 = vadd.s32 1, %v3590_v20  ;;  %v1517_v43 = vor.u32 8388608, %v3534_v62 }
 0x1c9   : > { %v1523_v16 = vand.u32 31, %v1521_v36  ;;  %v1695_v47 = vcvt.s32.f32 %v1688_v33  ;;  %v732_v42 = vmul.u32 %v3528_v10, %v716_v59  ;;  %vm734_vm2 = vc.u32 %v3595_v51, %v3589_v14 }
 0x1ca   : > { %v1693_v35 = vand.u32 2147483647, %v1692_v22  ;;  %v1706_v24 = vadd.s32 3, %v1702_v54  ;;  %v736_v4 = vsel %vm734_vm2, %v735_v12, %v3590_v20  ;;  %v3617_v45 = vshrl.u32 %v1521_v36, 5 }
 0x1cb   : > { %v2615_v32 = vpop.eup %2614  ;;  %v1524_v17 = vsub.s32 32, %v1523_v16  ;;  %v737_v37 = vadd.s32 %v736_v4, %v732_v42  ;;  %v1526_v62 = vshll.u32 %v2728_v21, %v1523_v16  ;;  %v1529_v10 = vshll.u32 %v2729_v25, %v1523_v16 }
 0x1cc   : > { %v2617_v28 = vpop.eup %2616  ;;  %v881_v61 = vxor.u32 2147483648, %v2615_v32  ;;  %v1696_v60 = vmul.f32 %v1695_v47, %v1693_v35  ;;  %v1532_v44 = vshll.u32 %v2730_v27, %v1523_v16  ;;  %v1535_v5 = vshll.u32 %v2731_v29, %v1523_v16 }
 0x1cd   : > { %v878_v8 = vxor.u32 2147483648, %v2617_v28  ;;  %v1527_v46 = vshrl.u32 %v2729_v25, %v1524_v17  ;;  %v1530_v19 = vshrl.u32 %v2730_v27, %v1524_v17  ;;  %v738_v63 = vadd.s32 536870912, %v737_v37 }
 0x1ce   : > { %v882_v23 = vsel %vm880_vm1, %v881_v61, %v2617_v28  ;;  %v1697_v53 = vxor.u32 2147483648, %v1696_v60  ;;  %v1533_v57 = vshrl.u32 %v2731_v29, %v1524_v17  ;;  %v1536_v40 = vshrl.u32 %v2732_v31, %v1524_v17 }
 0x1cf   : > { %v879_v39 = vsel %vm877_vm0, %v2615_v32, %v878_v8  ;;  %v1528_v1 = vor.u32 %v1527_v46, %v1526_v62  ;;  %v1531_v55 = vor.u32 %v1530_v19, %v1529_v10  ;;  %v739_v58 = vshrl.u32 %v738_v63, 30 }
 0x1d0   : > { %v883_v30 = vsel %vm876_vm12, %v879_v39, %v882_v23  ;;  %v1698_v49 = vsel %vm1615_vm6, %v1697_v53, %v1696_v60  ;;  %v1534_v33 = vor.u32 %v1533_v57, %v1532_v44  ;;  %v1538_v41 = vshll.u32 %v2732_v31, %v1523_v16 }
 0x1d1   : > { %v884_v56 = vsel %vm873_vm15, nan, %v883_v30  ;;  %v1701_v20 = vsel %vm3600_vm13, %v3315_v18, %v1698_v49  ;;  %v740_v7 = vshll.u32 %v739_v58, 30  ;;  %v1539_v59 = vshrl.u32 %v2733_v38, %v1524_v17 }
 0x1d2   : > { %2136 = vst [vmem:[%s3292_s29 + $0x18] sm:$0xff] %v884_v56  ;;  %2618 = vcosq.f32 %v1701_v20  ;;  %v1537_v22 = vor.u32 %v1536_v40, %v1535_v5  ;;  %v400_v26 = vadd.f32 %v3476_v48, %v3071_v2  ;;  %v1707_v54 = vand.u32 3, %v1706_v24  ;;  %v3692_v40 = vpop.f32.mrb[7].mxu0 }
 0x1d3   : > { %2620 = vsinq.f32 %v1701_v20  ;;  %v3645_v36 = vsub.s32 %v737_v37, %v740_v7  ;;  %v1540_v15 = vor.u32 %v1539_v59, %v1538_v41  ;;  %vm1541_vm3 = vcmp.lt.s32.totalorder %v3617_v45, 1 }
 0x1d4   : > { %vm679_vm4 = vcmp.lt.s32.totalorder %v3453_v9, 0  ;;  %v1525_v12 = vshrl.u32 %v2728_v21, %v1524_v17  ;;  %vm1544_vm5 = vcmp.lt.s32.totalorder %v3617_v45, 4  ;;  %v1549_v16 = vsel %vm1541_vm3, %v1528_v1, %v1531_v55 }
 0x1d5   : > { %v1557_v35 = vshll.u32 %v1517_v43, 8  ;;  %v743_v47 = vsub.s32 0, %v3645_v36  ;;  %vm1543_vm6 = vcmp.lt.s32.totalorder %v3617_v45, 3  ;;  %v1546_v2 = vsel %vm1544_vm5, %v1534_v33, 2102212464 }
 0x1d6   : > { %v1550_v42 = vsel %vm1544_vm5, %v1537_v22, 920167782  ;;  %vm1542_vm7 = vcmp.lt.s32.totalorder %v3617_v45, 2  ;;  %v1554_v24 = vsel %vm1544_vm5, %v1540_v15, 1326507024  ;;  %v3656_v4 = vmul.f32 30.0, %v400_v26 }
 0x1d7   : > { %v1551_v32 = vsel %vm1543_vm6, %v1534_v33, %v1550_v42  ;;  %v2274_v17 = vmin.u32 %v743_v47, %v3645_v36  ;;  %v1545_v28 = vsel %vm1541_vm3, %v1525_v12, %v1528_v1  ;;  %v1553_v61 = vsel %vm1541_vm3, %v1531_v55, %v1534_v33 }
 0x1d8   : > { %v1552_v43 = vsel %vm1542_vm7, %v1549_v16, %v1551_v32  ;;  %vm1705_vm8 = vweird.f32 %v3315_v18  ;;  %v1547_v60 = vsel %vm1543_vm6, %v1531_v55, %v1546_v2  ;;  %v1555_v37 = vsel %vm1543_vm6, %v1537_v22, %v1554_v24 }
 0x1d9   : > { %v3666_v62 = vmul.u32.u64.low %v1557_v35, %v1552_v43  ;;  %v3667_v8 = vmul.u32.u64.high %v1557_v35, %v1552_v43, %v3666_v62  ;;  %vm1708_vm9 = vcmp.lt.s32.totalorder %v1707_v54, 2  ;;  %vm3672_vm10 = vcmp.le.f32.partialorder %v677_v52, 0.7853982 }
 0x1da   : > { %v745_v10 = vclz %v2274_v17  ;;  %v763_v19 = vsub.s32 4, %v739_v58  ;;  %v440_v23 = vadd.f32 %v3476_v48, %v3167_v0  ;;  %vm1709_vm11 = vcmp.eq.s32.totalorder %v1707_v54, 0 }
 0x1db   : > { %v1556_v53 = vsel %vm1542_vm7, %v1553_v61, %v1555_v37  ;;  %v989_v63 = vand.u32 2147483647, %v3656_v4  ;;  %v992_v57 = vand.u32 2139095040, %v3656_v4  ;;  %v1548_v52 = vsel %vm1542_vm7, %v1545_v28, %v1547_v60 }
 0x1dc   : > { %v2619_v39 = vpop.eup %2618  ;;  %v2275_v1 = vadd.s32 4294967294, %v745_v10  ;;  %v3684_v55 = vmul.u32.u64.low %v1557_v35, %v1556_v53  ;;  %v3685_v44 = vmul.u32.u64.high %v1557_v35, %v1556_v53, %v3684_v55  ;;  %vm1712_vm12 = vcmp.eq.s32.totalorder %v1707_v54, 2 }
 0x1dd   : > { %v2621_v30 = vpop.eup %2620  ;;  %v1713_v49 = vxor.u32 2147483648, %v2619_v39  ;;  %v733_v0 = vadd.s32 %v3589_v14, %v3595_v51  ;;  %v993_v5 = vshrl.u32 %v992_v57, 23  ;;  %v764_v20 = vsel %vm679_vm4, %v763_v19, %v739_v58 }
 0x1de   : > { %v1710_v56 = vxor.u32 2147483648, %v2621_v30  ;;  %vm2276_vm13 = vcmp.lt.s32.totalorder %v2275_v1, 0  ;;  %v1567_v33 = vadd.s32 1, %v3667_v8  ;;  %v1564_v41 = vmul.u32 %v1557_v35, %v1548_v52 }
 0x1df   : > { %v1714_v45 = vsel %vm1712_vm12, %v1713_v49, %v2621_v30  ;;  %v748_v7 = vsel %vm2276_vm13, 0, %v2275_v1  ;;  %v2285_v59 = vadd.s32 4294967169, %v993_v5  ;;  %v996_v14 = vand.u32 8388607, %v989_v63 }
 0x1e0   : > { %v1711_v22 = vsel %vm1709_vm11, %v2619_v39, %v1710_v56  ;;  %v749_v26 = vsub.s32 32, %v748_v7  ;;  %v753_v15 = vsub.s32 4294967266, %v748_v7  ;;  %v750_v58 = vshll.u32 %v3645_v36, %v748_v7 }
 0x1e1   : > { %v1715_v51 = vsel %vm1708_vm9, %v1711_v22, %v1714_v45  ;;  %vm1566_vm14 = vc.u32 %v3685_v44, %v3666_v62  ;;  %v999_v12 = vadd.s32 1, %v2285_v59  ;;  %v766_v42 = vsel %vm3672_vm10, 0, %v764_v20 }
 0x1e2   : > { %v1716_v16 = vsel %vm1705_vm8, nan, %v1715_v51  ;;  %v751_v35 = vshrl.u32 %v733_v0, %v749_v26  ;;  %v754_v47 = vadd.s32 127, %v753_v15  ;;  %v1568_v2 = vsel %vm1566_vm14, %v1567_v33, %v3667_v8 }
 0x1e3   : > { %2144 = vst [vmem:[%s3292_s29 + $0x58] sm:$0xff] %v1716_v16  ;;  %v1569_v32 = vadd.s32 %v1568_v2, %v1564_v41  ;;  %vm1000_vm15 = vcmp.gt.s32.totalorder %v999_v12, 0  ;;  %v3707_v54 = vmul.f32 30.0, %v440_v23  ;;  %v997_v17 = vor.u32 8388608, %v996_v14 }
 0x1e4   : > { %v752_v36 = vor.u32 %v751_v35, %v750_v58  ;;  %v755_v24 = vshll.u32 %v754_v47, 23  ;;  %v1001_v28 = vsel %vm1000_vm15, %v999_v12, 0  ;;  %v3709_v60 = vadd.s32 3, %v766_v42 }
 0x1e5   : > { %v1570_v43 = vadd.s32 536870912, %v1569_v32  ;;  %v1003_v61 = vand.u32 31, %v1001_v28  ;;  %v3713_v53 = vshll.u32 %v997_v17, 8  ;;  %v1821_v57 = vand.u32 2147483647, %v3707_v54 }
 0x1e6   : > { %v756_v18 = vor.u32 4788187, %v755_v24  ;;  %v759_v19 = vcvt.s32.f32 %v752_v36  ;;  %v1824_v52 = vand.u32 2139095040, %v3707_v54  ;;  %v1002_v7 = vshrl.u32 %v1001_v28, 5 }
 0x1e7   : > { %v3711_v37 = vshrl.u32 %v1570_v43, 30  ;;  %v1004_v8 = vsub.s32 32, %v1003_v61  ;;  %v1006_v39 = vshll.u32 %v2728_v21, %v1003_v61  ;;  %v1009_v56 = vshll.u32 %v2729_v25, %v1003_v61 }
 0x1e8   : > { %v757_v10 = vand.u32 2147483647, %v756_v18  ;;  %v1012_v20 = vshll.u32 %v2730_v27, %v1003_v61  ;;  %v1015_v41 = vshll.u32 %v2731_v29, %v1003_v61  ;;  %v1018_v59 = vshll.u32 %v2732_v31, %v1003_v61 }
 0x1e9   : > { %v1572_v23 = vshll.u32 %v3711_v37, 30  ;;  %v1007_v1 = vshrl.u32 %v2729_v25, %v1004_v8  ;;  %v1010_v30 = vshrl.u32 %v2730_v27, %v1004_v8  ;;  %v1013_v49 = vshrl.u32 %v2731_v29, %v1004_v8 }
 0x1ea   : > { %v760_v55 = vmul.f32 %v759_v19, %v757_v10  ;;  %v1016_v0 = vshrl.u32 %v2732_v31, %v1004_v8  ;;  %v1019_v33 = vshrl.u32 %v2733_v38, %v1004_v8  ;;  %vm1511_vm0 = vcmp.lt.s32.totalorder %v3511_v50, 0 }
 0x1eb   : > { %v3723_v5 = vsub.s32 %v1569_v32, %v1572_v23  ;;  %v1008_v26 = vor.u32 %v1007_v1, %v1006_v39  ;;  %v1011_v15 = vor.u32 %v1010_v30, %v1009_v56  ;;  %v1014_v14 = vor.u32 %v1013_v49, %v1012_v20 }
 0x1ec   : > { %v761_v45 = vxor.u32 2147483648, %v760_v55  ;;  %v1565_v58 = vadd.s32 %v3666_v62, %v3685_v44  ;;  %v1017_v12 = vor.u32 %v1016_v0, %v1015_v41  ;;  %v1825_v16 = vshrl.u32 %v1824_v52, 23 }
 0x1ed   : > { %v1575_v22 = vsub.s32 0, %v3723_v5  ;;  %v1595_v2 = vsub.s32 4, %v3711_v37  ;;  %v1020_v42 = vor.u32 %v1019_v33, %v1018_v59  ;;  %v1005_v32 = vshrl.u32 %v2728_v21, %v1004_v8  ;;  %v3748_v8 = vpop.f32.mrb[7].mxu1 }
 0x1ee   : > { %v762_v51 = vsel %vm679_vm4, %v761_v45, %v760_v55  ;;  %vm1021_vm1 = vcmp.lt.s32.totalorder %v1002_v7, 1  ;;  %vm1024_vm2 = vcmp.lt.s32.totalorder %v1002_v7, 4  ;;  %vm3744_vm3 = vcmp.le.f32.partialorder %v1509_v11, 0.7853982 }
 0x1ef   : > { %v765_v35 = vsel %vm3672_vm10, %v3453_v9, %v762_v51  ;;  %v2306_v47 = vmin.u32 %v1575_v22, %v3723_v5  ;;  %v1026_v46 = vsel %vm1024_vm2, %v1014_v14, 2102212464  ;;  %v1029_v36 = vsel %vm1021_vm1, %v1008_v26, %v1011_v15 }
 0x1f0   : > { %2622 = vcosq.f32 %v765_v35  ;;  %vm1022_vm4 = vcmp.lt.s32.totalorder %v1002_v7, 2  ;;  %vm1023_vm5 = vcmp.lt.s32.totalorder %v1002_v7, 3  ;;  %v1030_v24 = vsel %vm1024_vm2, %v1017_v12, 920167782 }
 0x1f1   : > { %2624 = vsinq.f32 %v765_v35  ;;  %v1577_v44 = vclz %v2306_v47  ;;  %v1033_v17 = vsel %vm1021_vm1, %v1011_v15, %v1014_v14  ;;  %v1025_v43 = vsel %vm1021_vm1, %v1005_v32, %v1008_v26 }
 0x1f2   : > { %v1031_v61 = vsel %vm1023_vm5, %v1014_v14, %v1030_v24  ;;  %v1034_v18 = vsel %vm1024_vm2, %v1020_v42, 1326507024  ;;  %v1027_v10 = vsel %vm1023_vm5, %v1011_v15, %v1026_v46  ;;  %v2317_v23 = vadd.s32 4294967169, %v1825_v16 }
 0x1f3   : > { %v2307_v28 = vadd.s32 4294967294, %v1577_v44  ;;  %v1032_v19 = vsel %vm1022_vm4, %v1029_v36, %v1031_v61  ;;  %v1035_v11 = vsel %vm1023_vm5, %v1017_v12, %v1034_v18  ;;  %vm769_vm7 = vweird.f32 %v3453_v9 }
 0x1f4   : > { %v1036_v39 = vsel %vm1022_vm4, %v1033_v17, %v1035_v11  ;;  %v3753_v1 = vmul.u32.u64.low %v3713_v53, %v1032_v19  ;;  %v3754_v52 = vmul.u32.u64.high %v3713_v53, %v1032_v19, %v3753_v1  ;;  %v1831_v0 = vadd.s32 1, %v2317_v23 }
 0x1f5   : > { %vm2308_vm6 = vcmp.lt.s32.totalorder %v2307_v28, 0  ;;  %v3758_v30 = vmul.u32.u64.low %v3713_v53, %v1036_v39  ;;  %v3759_v49 = vmul.u32.u64.high %v3713_v53, %v1036_v39, %v3758_v30  ;;  %v1596_v33 = vsel %vm1511_vm0, %v1595_v2, %v3711_v37 }
 0x1f6   : > { %v1580_v55 = vsel %vm2308_vm6, 0, %v2307_v28  ;;  %v1028_v45 = vsel %vm1022_vm4, %v1025_v43, %v1027_v10  ;;  %v771_v41 = vand.u32 3, %v3709_v60  ;;  %v1828_v22 = vand.u32 8388607, %v1821_v57 }
 0x1f7   : > { %v1581_v56 = vsub.s32 32, %v1580_v55  ;;  %v1585_v20 = vsub.s32 4294967266, %v1580_v55  ;;  %v1582_v59 = vshll.u32 %v3723_v5, %v1580_v55  ;;  %vm1832_vm8 = vcmp.gt.s32.totalorder %v1831_v0, 0 }
 0x1f8   : > { %v1047_v14 = vadd.s32 1, %v3754_v52  ;;  %v1833_v51 = vsel %vm1832_vm8, %v1831_v0, 0  ;;  %v1598_v16 = vsel %vm3744_vm3, 0, %v1596_v33  ;;  %v1044_v37 = vmul.u32 %v3713_v53, %v1028_v45 }
 0x1f9   : > { %v1583_v26 = vshrl.u32 %v1565_v58, %v1581_v56  ;;  %v1586_v15 = vadd.s32 127, %v1585_v20  ;;  %vm1046_vm9 = vc.u32 %v3759_v49, %v3753_v1  ;;  %v1835_v60 = vand.u32 31, %v1833_v51 }
 0x1fa   : > { %v2623_v12 = vpop.eup %2622  ;;  %v1048_v58 = vsel %vm1046_vm9, %v1047_v14, %v3754_v52  ;;  %vm776_vm10 = vcmp.eq.s32.totalorder %v771_v41, 2  ;;  %vm772_vm11 = vcmp.lt.s32.totalorder %v771_v41, 2  ;;  %vm773_vm12 = vcmp.eq.s32.totalorder %v771_v41, 0 }
 0x1fb   : > { %v2625_v5 = vpop.eup %2624  ;;  %v777_v7 = vxor.u32 2147483648, %v2623_v12  ;;  %v1584_v35 = vor.u32 %v1583_v26, %v1582_v59  ;;  %v1587_v47 = vshll.u32 %v1586_v15, 23  ;;  %v1049_v42 = vadd.s32 %v1048_v58, %v1044_v37 }
 0x1fc   : > { %v774_v2 = vxor.u32 2147483648, %v2625_v5  ;;  %v1836_v32 = vsub.s32 32, %v1835_v60  ;;  %v1602_v36 = vadd.s32 3, %v1598_v16  ;;  %v1829_v17 = vor.u32 8388608, %v1828_v22 }
 0x1fd   : > { %v778_v44 = vsel %vm776_vm10, %v777_v7, %v2625_v5  ;;  %v1588_v46 = vor.u32 4788187, %v1587_v47  ;;  %v1050_v24 = vadd.s32 536870912, %v1049_v42  ;;  %v1591_v61 = vcvt.s32.f32 %v1584_v35 }
 0x1fe   : > { %v775_v53 = vsel %vm773_vm12, %v2623_v12, %v774_v2  ;;  %v1839_v18 = vshrl.u32 %v2729_v25, %v1836_v32  ;;  %v1842_v11 = vshrl.u32 %v2730_v27, %v1836_v32  ;;  %v1845_v23 = vshrl.u32 %v2731_v29, %v1836_v32 }
 0x1ff   : > { %v779_v28 = vsel %vm772_vm11, %v775_v53, %v778_v44  ;;  %v1589_v43 = vand.u32 2147483647, %v1588_v46  ;;  %v3780_v19 = vshrl.u32 %v1050_v24, 30  ;;  %v1834_v52 = vshrl.u32 %v1833_v51, 5 }
 0x200   : > { %v780_v10 = vsel %vm769_vm7, nan, %v779_v28  ;;  %v1847_v55 = vshll.u32 %v2731_v29, %v1835_v60  ;;  %v1848_v30 = vshrl.u32 %v2732_v31, %v1836_v32  ;;  %v1838_v56 = vshll.u32 %v2728_v21, %v1835_v60 }
 0x201   : > { %2135 = vst [vmem:[%s3292_s29 + $0x10] sm:$0xff] %v780_v10  ;;  %v1592_v39 = vmul.f32 %v1591_v61, %v1589_v43  ;;  %v1052_v0 = vshll.u32 %v3780_v19, 30  ;;  %v1841_v9 = vshll.u32 %v2729_v25, %v1835_v60  ;;  %v1844_v20 = vshll.u32 %v2730_v27, %v1835_v60 }
 0x202   : > { %v1849_v45 = vor.u32 %v1848_v30, %v1847_v55  ;;  %v1850_v41 = vshll.u32 %v2732_v31, %v1835_v60  ;;  %v1851_v59 = vshrl.u32 %v2733_v38, %v1836_v32  ;;  %v1840_v26 = vor.u32 %v1839_v18, %v1838_v56 }
 0x203   : > { %v1593_v33 = vxor.u32 2147483648, %v1592_v39  ;;  %v3793_v22 = vsub.s32 %v1049_v42, %v1052_v0  ;;  %v1843_v15 = vor.u32 %v1842_v11, %v1841_v9  ;;  %v1846_v14 = vor.u32 %v1845_v23, %v1844_v20 }
 0x204   : > { %v3797_v12 = vand.u32 3, %v1602_v36  ;;  %v1852_v16 = vor.u32 %v1851_v59, %v1850_v41  ;;  %v395_v37 = vadd.f32 %v3476_v48, %v3275_v13  ;;  %vm991_vm13 = vcmp.lt.s32.totalorder %v3656_v4, 0 }
 0x205   : > { %v1594_v51 = vsel %vm1511_vm0, %v1593_v33, %v1592_v39  ;;  %v1055_v5 = vsub.s32 0, %v3793_v22  ;;  %vm1856_vm14 = vcmp.lt.s32.totalorder %v1834_v52, 4  ;;  %v1869_v7 = vshll.u32 %v1829_v17, 8 }
 0x206   : > { %v1597_v60 = vsel %vm3744_vm3, %v3511_v50, %v1594_v51  ;;  %vm1853_vm15 = vcmp.lt.s32.totalorder %v1834_v52, 1  ;;  %vm1855_vm1 = vcmp.lt.s32.totalorder %v1834_v52, 3  ;;  %v1862_v35 = vsel %vm1856_vm14, %v1849_v45, 920167782 }
 0x207   : > { %2626 = vcosq.f32 %v1597_v60  ;;  %v2286_v47 = vmin.u32 %v1055_v5, %v3793_v22  ;;  %v1858_v58 = vsel %vm1856_vm14, %v1846_v14, 2102212464  ;;  %v1861_v2 = vsel %vm1853_vm15, %v1840_v26, %v1843_v15 }
 0x208   : > { %2628 = vsinq.f32 %v1597_v60  ;;  %v1837_v13 = vshrl.u32 %v2728_v21, %v1836_v32  ;;  %v1863_v62 = vsel %vm1855_vm1, %v1846_v14, %v1862_v35  ;;  %v1865_v42 = vsel %vm1853_vm15, %v1843_v15, %v1846_v14 }
 0x209   : > { %v1866_v44 = vsel %vm1856_vm14, %v1852_v16, 1326507024  ;;  %v1057_v46 = vclz %v2286_v47  ;;  %v1075_v53 = vsub.s32 4, %v3780_v19  ;;  %vm1854_vm0 = vcmp.lt.s32.totalorder %v1834_v52, 2 }
 0x20a   : > { %v3810_v36 = vmul.f32 30.0, %v395_v37  ;;  %v1857_v24 = vsel %vm1853_vm15, %v1837_v13, %v1840_v26  ;;  %v1859_v17 = vsel %vm1855_vm1, %v1843_v15, %v1858_v58  ;;  %v1864_v28 = vsel %vm1854_vm0, %v1861_v2, %v1863_v62 }
 0x20b   : > { %v1867_v43 = vsel %vm1855_vm1, %v1849_v45, %v1866_v44  ;;  %v2287_v61 = vadd.s32 4294967294, %v1057_v46  ;;  %v3814_v10 = vmul.u32.u64.low %v1869_v7, %v1864_v28  ;;  %v3815_v32 = vmul.u32.u64.high %v1869_v7, %v1864_v28, %v3814_v10 }
 0x20c   : > { %v1868_v18 = vsel %vm1854_vm0, %v1865_v42, %v1867_v43  ;;  %vm1605_vm2 = vcmp.eq.s32.totalorder %v3797_v12, 0  ;;  %vm3820_vm3 = vcmp.le.f32.partialorder %v989_v63, 0.7853982  ;;  %vm1601_vm4 = vweird.f32 %v3511_v50 }
 0x20d   : > { %v3824_v23 = vmul.u32.u64.low %v1869_v7, %v1868_v18  ;;  %v3825_v39 = vmul.u32.u64.high %v1869_v7, %v1868_v18, %v3824_v23  ;;  %vm1608_vm5 = vcmp.eq.s32.totalorder %v3797_v12, 2  ;;  %vm2288_vm6 = vcmp.lt.s32.totalorder %v2287_v61, 0 }
 0x20e   : > { %v1860_v52 = vsel %vm1854_vm0, %v1857_v24, %v1859_v17  ;;  %v888_v55 = vand.u32 2139095040, %v3810_v36  ;;  %v1045_v30 = vadd.s32 %v3753_v1, %v3759_v49  ;;  %v1060_v0 = vsel %vm2288_vm6, 0, %v2287_v61 }
 0x20f   : > { %v1076_v63 = vsel %vm991_vm13, %v1075_v53, %v3780_v19  ;;  %v435_v56 = vadd.f32 %v3476_v48, %v3386_v34  ;;  %v1061_v9 = vsub.s32 32, %v1060_v0  ;;  %v1065_v20 = vsub.s32 4294967266, %v1060_v0 }
 0x210   : > { %v1879_v33 = vadd.s32 1, %v3815_v32  ;;  %v885_v45 = vand.u32 2147483647, %v3810_v36  ;;  %v1062_v59 = vshll.u32 %v3793_v22, %v1060_v0  ;;  %v1876_v26 = vmul.u32 %v1869_v7, %v1860_v52 }
 0x211   : > { %v2627_v41 = vpop.eup %2626  ;;  %vm1878_vm7 = vc.u32 %v3825_v39, %v3814_v10  ;;  %v889_v1 = vshrl.u32 %v888_v55, 23  ;;  %v1063_v14 = vshrl.u32 %v1045_v30, %v1061_v9  ;;  %v1066_v19 = vadd.s32 127, %v1065_v20 }
 0x212   : > { %v2629_v49 = vpop.eup %2628  ;;  %v1609_v15 = vxor.u32 2147483648, %v2627_v41  ;;  %v1880_v51 = vsel %vm1878_vm7, %v1879_v33, %v3815_v32  ;;  %v1078_v16 = vsel %vm3820_vm3, 0, %v1076_v63  ;;  %v892_v35 = vand.u32 8388607, %v885_v45 }
 0x213   : > { %v1606_v34 = vxor.u32 2147483648, %v2629_v49  ;;  %v1881_v37 = vadd.s32 %v1880_v51, %v1876_v26  ;;  %v2281_v60 = vadd.s32 4294967169, %v889_v1  ;;  %v1064_v22 = vor.u32 %v1063_v14, %v1062_v59 }
 0x214   : > { %v1610_v5 = vsel %vm1608_vm5, %v1609_v15, %v2629_v49  ;;  %v1067_v7 = vshll.u32 %v1066_v19, 23  ;;  %vm1604_vm8 = vcmp.lt.s32.totalorder %v3797_v12, 2  ;;  %v1082_v42 = vadd.s32 3, %v1078_v16 }
 0x215   : > { %v1607_v47 = vsel %vm1605_vm2, %v2627_v41, %v1606_v34  ;;  %v1882_v58 = vadd.s32 536870912, %v1881_v37  ;;  %v895_v2 = vadd.s32 1, %v2281_v60  ;;  %v410_v44 = vadd.f32 %v3476_v48, %v3499_v3 }
 0x216   : > { %v1611_v13 = vsel %vm1604_vm8, %v1607_v47, %v1610_v5  ;;  %v1068_v62 = vor.u32 4788187, %v1067_v7  ;;  %v3857_v24 = vmul.f32 30.0, %v435_v56  ;;  %v1071_v12 = vcvt.s32.f32 %v1064_v22 }
 0x217   : > { %v1612_v46 = vsel %vm1601_vm4, nan, %v1611_v13  ;;  %v3855_v53 = vshrl.u32 %v1882_v58, 30  ;;  %vm896_vm9 = vcmp.gt.s32.totalorder %v895_v2, 0  ;;  %v893_v28 = vor.u32 8388608, %v892_v35 }
 0x218   : > { %2143 = vst [vmem:[%s3292_s29 + $0x50] sm:$0xff] %v1612_v46  ;;  %v1069_v17 = vand.u32 2147483647, %v1068_v62  ;;  %v897_v43 = vsel %vm896_vm9, %v895_v2, 0  ;;  %v3861_v23 = vand.u32 3, %v1082_v42  ;;  %v1877_v48 = vadd.s32 %v3814_v10, %v3825_v39 }
 0x219   : > { %v1884_v61 = vshll.u32 %v3855_v53, 30  ;;  %v899_v18 = vand.u32 31, %v897_v43  ;;  %v3866_v52 = vmul.f32 30.0, %v410_v44  ;;  %v3868_v30 = vshll.u32 %v893_v28, 8 }
 0x21a   : > { %v1072_v32 = vmul.f32 %v1071_v12, %v1069_v17  ;;  %v1717_v0 = vand.u32 2147483647, %v3857_v24  ;;  %v1720_v63 = vand.u32 2139095040, %v3857_v24  ;;  %v898_v9 = vshrl.u32 %v897_v43, 5 }
 0x21b   : > { %v3864_v3 = vsub.s32 %v1881_v37, %v1884_v61  ;;  %v900_v50 = vsub.s32 32, %v899_v18  ;;  %v902_v20 = vshll.u32 %v2728_v21, %v899_v18  ;;  %vm1823_vm10 = vcmp.lt.s32.totalorder %v3707_v54, 0 }
 0x21c   : > { %v1073_v55 = vxor.u32 2147483648, %v1072_v32  ;;  %v905_v39 = vshll.u32 %v2729_v25, %v899_v18  ;;  %v908_v49 = vshll.u32 %v2730_v27, %v899_v18  ;;  %v911_v15 = vshll.u32 %v2731_v29, %v899_v18 }
 0x21d   : > { %v1887_v56 = vsub.s32 0, %v3864_v3  ;;  %v903_v33 = vshrl.u32 %v2729_v25, %v900_v50  ;;  %v906_v41 = vshrl.u32 %v2730_v27, %v900_v50  ;;  %v909_v59 = vshrl.u32 %v2731_v29, %v900_v50 }
 0x21e   : > { %v1074_v10 = vsel %vm991_vm13, %v1073_v55, %v1072_v32  ;;  %v912_v51 = vshrl.u32 %v2732_v31, %v900_v50  ;;  %v1907_v16 = vsub.s32 4, %v3855_v53  ;;  %v901_v60 = vshrl.u32 %v2728_v21, %v900_v50 }
 0x21f   : > { %v1077_v26 = vsel %vm3820_vm3, %v3656_v4, %v1074_v10  ;;  %v2318_v1 = vmin.u32 %v1887_v56, %v3864_v3  ;;  %v904_v14 = vor.u32 %v903_v33, %v902_v20  ;;  %v907_v19 = vor.u32 %v906_v41, %v905_v39 }
 0x220   : > { %2630 = vcosq.f32 %v1077_v26  ;;  %v910_v37 = vor.u32 %v909_v59, %v908_v49  ;;  %v913_v11 = vor.u32 %v912_v51, %v911_v15  ;;  %v914_v5 = vshll.u32 %v2732_v31, %v899_v18 }
 0x221   : > { %2632 = vsinq.f32 %v1077_v26  ;;  %v1889_v34 = vclz %v2318_v1  ;;  %v915_v22 = vshrl.u32 %v2733_v38, %v900_v50  ;;  %vm3894_vm11 = vcmp.le.f32.partialorder %v1821_v57, 0.7853982 }
 0x222   : > { %vm917_vm12 = vcmp.lt.s32.totalorder %v898_v9, 1  ;;  %vm919_vm13 = vcmp.lt.s32.totalorder %v898_v9, 3  ;;  %v1721_v47 = vshrl.u32 %v1720_v63, 23  ;;  %vm920_vm14 = vcmp.lt.s32.totalorder %v898_v9, 4 }
 0x223   : > { %v2319_v35 = vadd.s32 4294967294, %v1889_v34  ;;  %v916_v58 = vor.u32 %v915_v22, %v914_v5  ;;  %v921_v2 = vsel %vm917_vm12, %v901_v60, %v904_v14  ;;  %v925_v13 = vsel %vm917_vm12, %v904_v14, %v907_v19 }
 0x224   : > { %vm1085_vm15 = vcmp.eq.s32.totalorder %v3861_v23, 0  ;;  %v922_v62 = vsel %vm920_vm14, %v910_v37, 2102212464  ;;  %v926_v42 = vsel %vm920_vm14, %v913_v11, 920167782  ;;  %v929_v44 = vsel %vm917_vm12, %v907_v19, %v910_v37 }
 0x225   : > { %vm2320_vm1 = vcmp.lt.s32.totalorder %v2319_v35, 0  ;;  %vm1084_vm0 = vcmp.lt.s32.totalorder %v3861_v23, 2  ;;  %v923_v46 = vsel %vm919_vm13, %v907_v19, %v922_v62  ;;  %v927_v17 = vsel %vm919_vm13, %v910_v37, %v926_v42 }
 0x226   : > { %v1892_v57 = vsel %vm2320_vm1, 0, %v2319_v35  ;;  %v930_v12 = vsel %vm920_vm14, %v916_v58, 1326507024  ;;  %vm1081_vm2 = vweird.f32 %v3656_v4  ;;  %v1908_v61 = vsel %vm1823_vm10, %v1907_v16, %v3855_v53 }
 0x227   : > { %v1893_v28 = vsub.s32 32, %v1892_v57  ;;  %v1897_v43 = vsub.s32 4294967266, %v1892_v57  ;;  %vm918_vm3 = vcmp.lt.s32.totalorder %v898_v9, 2  ;;  %v1894_v18 = vshll.u32 %v3864_v3, %v1892_v57 }
 0x228   : > { %v928_v32 = vsel %vm918_vm3, %v925_v13, %v927_v17  ;;  %v931_v50 = vsel %vm919_vm13, %v913_v11, %v930_v12  ;;  %v2313_v55 = vadd.s32 4294967169, %v1721_v47  ;;  %v924_v20 = vsel %vm918_vm3, %v921_v2, %v923_v46 }
 0x229   : > { %v1895_v63 = vshrl.u32 %v1877_v48, %v1893_v28  ;;  %v1898_v56 = vadd.s32 127, %v1897_v43  ;;  %v932_v33 = vsel %vm918_vm3, %v929_v44, %v931_v50  ;;  %vm1088_vm4 = vcmp.eq.s32.totalorder %v3861_v23, 2 }
 0x22a   : > { %v2631_v10 = vpop.eup %2630  ;;  %v3909_v39 = vmul.u32.u64.low %v3868_v30, %v932_v33  ;;  %v3910_v41 = vmul.u32.u64.high %v3868_v30, %v932_v33, %v3909_v39  ;;  %v3913_v59 = vmul.u32.u64.low %v3868_v30, %v928_v32  ;;  %v3914_v26 = vmul.u32.u64.high %v3868_v30, %v928_v32, %v3913_v59 }
 0x22b   : > { %v2633_v53 = vpop.eup %2632  ;;  %v1089_v3 = vxor.u32 2147483648, %v2631_v10  ;;  %v1896_v1 = vor.u32 %v1895_v63, %v1894_v18  ;;  %v1899_v9 = vshll.u32 %v1898_v56, 23  ;;  %v1727_v49 = vadd.s32 1, %v2313_v55 }
 0x22c   : > { %v1086_v15 = vxor.u32 2147483648, %v2633_v53  ;;  %v1910_v48 = vsel %vm3894_vm11, 0, %v1908_v61  ;;  %v1724_v14 = vand.u32 8388607, %v1717_v0  ;;  %v940_v34 = vmul.u32 %v3868_v30, %v924_v20 }
 0x22d   : > { %v1090_v19 = vsel %vm1088_vm4, %v1089_v3, %v2633_v53  ;;  %v1900_v51 = vor.u32 4788187, %v1899_v9  ;;  %vm1728_vm5 = vcmp.gt.s32.totalorder %v1727_v49, 0  ;;  %vm942_vm6 = vc.u32 %v3910_v41, %v3913_v59 }
 0x22e   : > { %v1087_v16 = vsel %vm1085_vm15, %v2631_v10, %v1086_v15  ;;  %v943_v37 = vadd.s32 1, %v3914_v26  ;;  %v1200_v60 = vand.u32 2139095040, %v3866_v52  ;;  %v1903_v22 = vcvt.s32.f32 %v1896_v1 }
 0x22f   : > { %v1091_v11 = vsel %vm1084_vm0, %v1087_v16, %v1090_v19  ;;  %v1901_v5 = vand.u32 2147483647, %v1900_v51  ;;  %v1729_v35 = vsel %vm1728_vm5, %v1727_v49, 0  ;;  %v1914_v13 = vadd.s32 3, %v1910_v48 }
 0x230   : > { %v1092_v30 = vsel %vm1081_vm2, nan, %v1091_v11  ;;  %v944_v47 = vsel %vm942_vm6, %v943_v37, %v3914_v26  ;;  %v1731_v58 = vand.u32 31, %v1729_v35  ;;  %v1725_v42 = vor.u32 8388608, %v1724_v14 }
 0x231   : > { %2138 = vst [vmem:[%s3292_s29 + $0x28] sm:$0xff] %v1092_v30  ;;  %v1904_v2 = vmul.f32 %v1903_v22, %v1901_v5  ;;  %v945_v62 = vadd.s32 %v944_v47, %v940_v34  ;;  %v3935_v44 = vshrl.u32 %v1729_v35, 5  ;;  %v1201_v46 = vshrl.u32 %v1200_v60, 23 }
 0x232   : > { %v1732_v57 = vsub.s32 32, %v1731_v58  ;;  %v1734_v23 = vshll.u32 %v2728_v21, %v1731_v58  ;;  %v1737_v28 = vshll.u32 %v2729_v25, %v1731_v58  ;;  %v1740_v4 = vshll.u32 %v2730_v27, %v1731_v58 }
 0x233   : > { %v1905_v17 = vxor.u32 2147483648, %v1904_v2  ;;  %v946_v12 = vadd.s32 536870912, %v945_v62  ;;  %v1743_v32 = vshll.u32 %v2731_v29, %v1731_v58  ;;  %v1746_v39 = vshll.u32 %v2732_v31, %v1731_v58 }
 0x234   : > { %v1735_v43 = vshrl.u32 %v2729_v25, %v1732_v57  ;;  %v1738_v61 = vshrl.u32 %v2730_v27, %v1732_v57  ;;  %v1741_v18 = vshrl.u32 %v2731_v29, %v1732_v57  ;;  %v1744_v63 = vshrl.u32 %v2732_v31, %v1732_v57 }
 0x235   : > { %v1906_v50 = vsel %vm1823_vm10, %v1905_v17, %v1904_v2  ;;  %v947_v55 = vshrl.u32 %v946_v12, 30  ;;  %v1747_v56 = vshrl.u32 %v2733_v38, %v1732_v57  ;;  %v1915_v9 = vand.u32 3, %v1914_v13 }
 0x236   : > { %v1909_v20 = vsel %vm3894_vm11, %v3707_v54, %v1906_v50  ;;  %v1736_v33 = vor.u32 %v1735_v43, %v1734_v23  ;;  %v1739_v10 = vor.u32 %v1738_v61, %v1737_v28  ;;  %v1745_v53 = vor.u32 %v1744_v63, %v1743_v32 }
 0x237   : > { %2634 = vcosq.f32 %v1909_v20  ;;  %v948_v26 = vshll.u32 %v947_v55, 30  ;;  %v1742_v3 = vor.u32 %v1741_v18, %v1740_v4  ;;  %v1748_v1 = vor.u32 %v1747_v56, %v1746_v39 }
 0x238   : > { %2636 = vsinq.f32 %v1909_v20  ;;  %vm1749_vm7 = vcmp.lt.s32.totalorder %v3935_v44, 1  ;;  %vm1752_vm8 = vcmp.lt.s32.totalorder %v3935_v44, 4  ;;  %v1765_v15 = vshll.u32 %v1725_v42, 8 }
 0x239   : > { %v3952_v49 = vsub.s32 %v945_v62, %v948_v26  ;;  %v1757_v7 = vsel %vm1749_vm7, %v1736_v33, %v1739_v10  ;;  %v2293_v48 = vadd.s32 4294967169, %v1201_v46  ;;  %vm1750_vm9 = vcmp.lt.s32.totalorder %v3935_v44, 2 }
 0x23a   : > { %vm1751_vm10 = vcmp.lt.s32.totalorder %v3935_v44, 3  ;;  %v1758_v19 = vsel %vm1752_vm8, %v1745_v53, 920167782  ;;  %v1754_v51 = vsel %vm1752_vm8, %v1742_v3, 2102212464  ;;  %v1761_v16 = vsel %vm1749_vm7, %v1739_v10, %v1742_v3 }
 0x23b   : > { %v951_v14 = vsub.s32 0, %v3952_v49  ;;  %v1759_v34 = vsel %vm1751_vm10, %v1742_v3, %v1758_v19  ;;  %v1762_v37 = vsel %vm1752_vm8, %v1748_v1, 1326507024  ;;  %v1733_v11 = vshrl.u32 %v2728_v21, %v1732_v57 }
 0x23c   : > { %v1760_v5 = vsel %vm1750_vm9, %v1757_v7, %v1759_v34  ;;  %v1763_v22 = vsel %vm1751_vm10, %v1745_v53, %v1762_v37  ;;  %vm1913_vm11 = vweird.f32 %v3707_v54  ;;  %vm887_vm12 = vcmp.lt.s32.totalorder %v3810_v36, 0 }
 0x23d   : > { %v2282_v60 = vmin.u32 %v951_v14, %v3952_v49  ;;  %v1764_v35 = vsel %vm1750_vm9, %v1761_v16, %v1763_v22  ;;  %v3975_v30 = vmul.u32.u64.low %v1765_v15, %v1760_v5  ;;  %v3976_v47 = vmul.u32.u64.high %v1765_v15, %v1760_v5, %v3975_v30 }
 0x23e   : > { %v1753_v2 = vsel %vm1749_vm7, %v1733_v11, %v1736_v33  ;;  %v1755_v13 = vsel %vm1751_vm10, %v1739_v10, %v1754_v51  ;;  %v1197_v62 = vand.u32 2147483647, %v3866_v52  ;;  %v971_v42 = vsub.s32 4, %v947_v55 }
 0x23f   : > { %v953_v58 = vclz %v2282_v60  ;;  %v3984_v57 = vmul.u32.u64.low %v1765_v15, %v1764_v35  ;;  %v3985_v23 = vmul.u32.u64.high %v1765_v15, %v1764_v35, %v3984_v57  ;;  %v1207_v46 = vadd.s32 1, %v2293_v48 }
 0x240   : > { %vm1916_vm13 = vcmp.lt.s32.totalorder %v1915_v9, 2  ;;  %vm1917_vm14 = vcmp.eq.s32.totalorder %v1915_v9, 0  ;;  %vm1920_vm15 = vcmp.eq.s32.totalorder %v1915_v9, 2  ;;  %v1756_v43 = vsel %vm1750_vm9, %v1753_v2, %v1755_v13 }
 0x241   : > { %v2635_v17 = vpop.eup %2634  ;;  %v2283_v12 = vadd.s32 4294967294, %v953_v58  ;;  %v1775_v61 = vadd.s32 1, %v3976_v47  ;;  %vm1208_vm1 = vcmp.gt.s32.totalorder %v1207_v46, 0  ;;  %v941_v32 = vadd.s32 %v3913_v59, %v3910_v41 }
 0x242   : > { %v2637_v28 = vpop.eup %2636  ;;  %v1921_v4 = vxor.u32 2147483648, %v2635_v17  ;;  %v1209_v50 = vsel %vm1208_vm1, %v1207_v46, 0  ;;  %v972_v20 = vsel %vm887_vm12, %v971_v42, %v947_v55  ;;  %vm1774_vm2 = vc.u32 %v3985_v23, %v3975_v30 }
 0x243   : > { %v1918_v18 = vxor.u32 2147483648, %v2637_v28  ;;  %vm2284_vm0 = vcmp.lt.s32.totalorder %v2283_v12, 0  ;;  %v1772_v39 = vmul.u32 %v1765_v15, %v1756_v43  ;;  %v1776_v59 = vsel %vm1774_vm2, %v1775_v61, %v3976_v47 }
 0x244   : > { %v1922_v63 = vsel %vm1920_vm15, %v1921_v4, %v2637_v28  ;;  %v956_v56 = vsel %vm2284_vm0, 0, %v2283_v12  ;;  %v1211_v53 = vand.u32 31, %v1209_v50  ;;  %vm4005_vm3 = vcmp.le.f32.partialorder %v885_v45, 0.7853982 }
 0x245   : > { %v1919_v44 = vsel %vm1917_vm14, %v2635_v17, %v1918_v18  ;;  %v957_v33 = vsub.s32 32, %v956_v56  ;;  %v961_v10 = vsub.s32 4294967266, %v956_v56  ;;  %v958_v41 = vshll.u32 %v3952_v49, %v956_v56  ;;  %v4012_v49 = vld [vmem:[%s4360_s2] ss:$0 sm:$0xff] }
 0x246   : > { %v1923_v26 = vsel %vm1916_vm13, %v1919_v44, %v1922_v63  ;;  %v1777_v7 = vadd.s32 %v1776_v59, %v1772_v39  ;;  %v1212_v9 = vsub.s32 32, %v1211_v53  ;;  %v450_v54 = vadd.f32 %v4012_v49, %v3554_v6 }
 0x247   : > { %v1924_v3 = vsel %vm1913_vm11, nan, %v1923_v26  ;;  %v959_v1 = vshrl.u32 %v941_v32, %v957_v33  ;;  %v962_v55 = vadd.s32 127, %v961_v10  ;;  %v1204_v51 = vand.u32 8388607, %v1197_v62 }
 0x248   : > { %2146 = vst [vmem:[%s3292_s29 + $0x68] sm:$0xff] %v1924_v3  ;;  %v1778_v19 = vadd.s32 536870912, %v1777_v7  ;;  %v974_v45 = vsel %vm4005_vm3, 0, %v972_v20  ;;  %v1214_v34 = vshll.u32 %v2728_v21, %v1211_v53  ;;  %v1215_v16 = vshrl.u32 %v2729_v25, %v1212_v9 }
 0x249   : > { %v960_v15 = vor.u32 %v959_v1, %v958_v41  ;;  %v963_v14 = vshll.u32 %v962_v55, 23  ;;  %v1218_v37 = vshrl.u32 %v2730_v27, %v1212_v9  ;;  %v1221_v5 = vshrl.u32 %v2731_v29, %v1212_v9 }
 0x24a   : > { %v1779_v11 = vshrl.u32 %v1778_v19, 30  ;;  %v1224_v6 = vshrl.u32 %v2732_v31, %v1212_v9  ;;  %v1210_v22 = vshrl.u32 %v1209_v50, 5  ;;  %v1217_v35 = vshll.u32 %v2729_v25, %v1211_v53 }
 0x24b   : > { %v964_v60 = vor.u32 4788187, %v963_v14  ;;  %v1220_v47 = vshll.u32 %v2730_v27, %v1211_v53  ;;  %v1223_v58 = vshll.u32 %v2731_v29, %v1211_v53  ;;  %v967_v13 = vcvt.s32.f32 %v960_v15 }
 0x24c   : > { %v1780_v42 = vshll.u32 %v1779_v11, 30  ;;  %v1216_v57 = vor.u32 %v1215_v16, %v1214_v34  ;;  %v1219_v46 = vor.u32 %v1218_v37, %v1217_v35  ;;  %v1226_v12 = vshll.u32 %v2732_v31, %v1211_v53 }
 0x24d   : > { %v965_v2 = vand.u32 2147483647, %v964_v60  ;;  %v1225_v17 = vor.u32 %v1224_v6, %v1223_v58  ;;  %v1227_v28 = vshrl.u32 %v2733_v38, %v1212_v9  ;;  %v978_v43 = vadd.s32 3, %v974_v45 }
 0x24e   : > { %v4030_v61 = vsub.s32 %v1777_v7, %v1780_v42  ;;  %v1222_v18 = vor.u32 %v1221_v5, %v1220_v47  ;;  %v1205_v32 = vor.u32 8388608, %v1204_v51  ;;  %v1213_v50 = vshrl.u32 %v2728_v21, %v1212_v9 }
 0x24f   : > { %v968_v4 = vmul.f32 %v967_v13, %v965_v2  ;;  %v1228_v63 = vor.u32 %v1227_v28, %v1226_v12  ;;  %v4033_v56 = vmul.f32 30.0, %v450_v54  ;;  %vm1229_vm4 = vcmp.lt.s32.totalorder %v1210_v22, 1 }
 0x250   : > { %v1783_v44 = vsub.s32 0, %v4030_v61  ;;  %vm1232_vm5 = vcmp.lt.s32.totalorder %v1210_v22, 4  ;;  %vm1230_vm6 = vcmp.lt.s32.totalorder %v1210_v22, 2  ;;  %vm1231_vm7 = vcmp.lt.s32.totalorder %v1210_v22, 3 }
 0x251   : > { %v969_v20 = vxor.u32 2147483648, %v968_v4  ;;  %v1237_v33 = vsel %vm1229_vm4, %v1216_v57, %v1219_v46  ;;  %v1238_v10 = vsel %vm1232_vm5, %v1225_v17, 920167782  ;;  %v1234_v41 = vsel %vm1232_vm5, %v1222_v18, 2102212464 }
 0x252   : > { %v2314_v26 = vmin.u32 %v1783_v44, %v4030_v61  ;;  %v1239_v59 = vsel %vm1231_vm7, %v1222_v18, %v1238_v10  ;;  %v1241_v1 = vsel %vm1229_vm4, %v1219_v46, %v1222_v18  ;;  %v1242_v55 = vsel %vm1232_vm5, %v1228_v63, 1326507024 }
 0x253   : > { %v970_v39 = vsel %vm887_vm12, %v969_v20, %v968_v4  ;;  %v1240_v3 = vsel %vm1230_vm6, %v1237_v33, %v1239_v59  ;;  %v1803_v9 = vsub.s32 4, %v1779_v11  ;;  %v1245_v54 = vshll.u32 %v1205_v32, 8 }
 0x254   : > { %v973_v53 = vsel %vm4005_vm3, %v3810_v36, %v970_v39  ;;  %v1785_v7 = vclz %v2314_v26  ;;  %v1233_v15 = vsel %vm1229_vm4, %v1213_v50, %v1216_v57  ;;  %v1235_v14 = vsel %vm1231_vm7, %v1219_v46, %v1234_v41 }
 0x255   : > { %2638 = vcosq.f32 %v973_v53  ;;  %v1243_v19 = vsel %vm1231_vm7, %v1225_v17, %v1242_v55  ;;  %v4050_v45 = vmul.u32.u64.low %v1245_v54, %v1240_v3  ;;  %v4051_v34 = vmul.u32.u64.high %v1245_v54, %v1240_v3, %v4050_v45 }
 0x256   : > { %2640 = vsinq.f32 %v973_v53  ;;  %v2315_v51 = vadd.s32 4294967294, %v1785_v7  ;;  %v1244_v48 = vsel %vm1230_vm6, %v1241_v1, %v1243_v19  ;;  %vm1719_vm8 = vcmp.lt.s32.totalorder %v3857_v24, 0 }
 0x257   : > { %v4054_v16 = vmul.u32.u64.low %v1245_v54, %v1244_v48  ;;  %v4055_v37 = vmul.u32.u64.high %v1245_v54, %v1244_v48, %v4054_v16  ;;  %v2032_v60 = vand.u32 2139095040, %v4033_v56  ;;  %vm4060_vm9 = vcmp.le.f32.partialorder %v1717_v0, 0.7853982 }
 0x258   : > { %vm2316_vm10 = vcmp.lt.s32.totalorder %v2315_v51, 0  ;;  %v1804_v6 = vsel %vm1719_vm8, %v1803_v9, %v1779_v11  ;;  %v1236_v35 = vsel %vm1230_vm6, %v1233_v15, %v1235_v14  ;;  %v979_v47 = vand.u32 3, %v978_v43 }
 0x259   : > { %v1788_v58 = vsel %vm2316_vm10, 0, %v2315_v51  ;;  %v2029_v2 = vand.u32 2147483647, %v4033_v56  ;;  %v2033_v13 = vshrl.u32 %v2032_v60, 23  ;;  %v1773_v42 = vadd.s32 %v3975_v30, %v3985_v23 }
 0x25a   : > { %v1789_v57 = vsub.s32 32, %v1788_v58  ;;  %v1793_v46 = vsub.s32 4294967266, %v1788_v58  ;;  %v1255_v0 = vadd.s32 1, %v4051_v34  ;;  %v1806_v17 = vsel %vm4060_vm9, 0, %v1804_v6 }
 0x25b   : > { %v1252_v12 = vmul.u32 %v1245_v54, %v1236_v35  ;;  %vm1254_vm11 = vc.u32 %v4055_v37, %v4050_v45  ;;  %v2325_v11 = vadd.s32 4294967169, %v2033_v13  ;;  %v1790_v22 = vshll.u32 %v4030_v61, %v1788_v58 }
 0x25c   : > { %v1791_v28 = vshrl.u32 %v1773_v42, %v1789_v57  ;;  %v1794_v4 = vadd.s32 127, %v1793_v46  ;;  %v1256_v43 = vsel %vm1254_vm11, %v1255_v0, %v4051_v34  ;;  %v405_v30 = vadd.f32 %v4012_v49, %v3692_v40 }
 0x25d   : > { %v1257_v18 = vadd.s32 %v1256_v43, %v1252_v12  ;;  %v2039_v32 = vadd.s32 1, %v2325_v11  ;;  %vm981_vm12 = vcmp.eq.s32.totalorder %v979_v47, 0  ;;  %vm984_vm13 = vcmp.eq.s32.totalorder %v979_v47, 2 }
 0x25e   : > { %v1792_v50 = vor.u32 %v1791_v28, %v1790_v22  ;;  %v1795_v63 = vshll.u32 %v1794_v4, 23  ;;  %v1810_v33 = vadd.s32 3, %v1806_v17  ;;  %v2036_v26 = vand.u32 8388607, %v2029_v2 }
 0x25f   : > { %v2639_v23 = vpop.eup %2638  ;;  %v1258_v10 = vadd.s32 536870912, %v1257_v18  ;;  %vm2040_vm14 = vcmp.gt.s32.totalorder %v2039_v32, 0  ;;  %v4082_v3 = vmul.f32 30.0, %v405_v30  ;;  %vm980_vm15 = vcmp.lt.s32.totalorder %v979_v47, 2 }
 0x260   : > { %v2641_v20 = vpop.eup %2640  ;;  %v985_v44 = vxor.u32 2147483648, %v2639_v23  ;;  %v1796_v39 = vor.u32 4788187, %v1795_v63  ;;  %v2041_v41 = vsel %vm2040_vm14, %v2039_v32, 0  ;;  %v1799_v7 = vcvt.s32.f32 %v1792_v50 }
 0x261   : > { %v982_v61 = vxor.u32 2147483648, %v2641_v20  ;;  %v4080_v53 = vshrl.u32 %v1258_v10, 30  ;;  %v2043_v40 = vand.u32 31, %v2041_v41  ;;  %vm977_vm1 = vweird.f32 %v3810_v36 }
 0x262   : > { %v986_v59 = vsel %vm984_vm13, %v985_v44, %v2641_v20  ;;  %v1797_v55 = vand.u32 2147483647, %v1796_v39  ;;  %v4087_v51 = vand.u32 3, %v1810_v33  ;;  %v1253_v48 = vadd.s32 %v4050_v45, %v4055_v37 }
 0x263   : > { %v983_v1 = vsel %vm981_vm12, %v2639_v23, %v982_v61  ;;  %v1260_v54 = vshll.u32 %v4080_v53, 30  ;;  %v2044_v15 = vsub.s32 32, %v2043_v40  ;;  %v2037_v16 = vor.u32 8388608, %v2036_v26 }
 0x264   : > { %v987_v9 = vsel %vm980_vm15, %v983_v1, %v986_v59  ;;  %v1800_v19 = vmul.f32 %v1799_v7, %v1797_v55  ;;  %v1096_v6 = vand.u32 2139095040, %v4082_v3  ;;  %v4095_v36 = vshrl.u32 %v2041_v41, 5 }
 0x265   : > { %v988_v14 = vsel %vm977_vm1, nan, %v987_v9  ;;  %v4091_v34 = vsub.s32 %v1257_v18, %v1260_v54  ;;  %v2047_v60 = vshrl.u32 %v2729_v25, %v2044_v15  ;;  %v2046_v47 = vshll.u32 %v2728_v21, %v2043_v40 }
 0x266   : > { %2137 = vst [vmem:[%s3292_s29 + $0x20] sm:$0xff] %v988_v14  ;;  %v1801_v35 = vxor.u32 2147483648, %v1800_v19  ;;  %v2050_v58 = vshrl.u32 %v2730_v27, %v2044_v15  ;;  %v2049_v42 = vshll.u32 %v2729_v25, %v2043_v40  ;;  %v2052_v45 = vshll.u32 %v2730_v27, %v2043_v40 }
 0x267   : > { %v1263_v13 = vsub.s32 0, %v4091_v34  ;;  %v2053_v37 = vshrl.u32 %v2731_v29, %v2044_v15  ;;  %v2048_v46 = vor.u32 %v2047_v60, %v2046_v47  ;;  %v2055_v0 = vshll.u32 %v2731_v29, %v2043_v40 }
 0x268   : > { %v1802_v57 = vsel %vm1719_vm8, %v1801_v35, %v1800_v19  ;;  %v2056_v17 = vshrl.u32 %v2732_v31, %v2044_v15  ;;  %v2051_v22 = vor.u32 %v2050_v58, %v2049_v42  ;;  %v2058_v43 = vshll.u32 %v2732_v31, %v2043_v40 }
 0x269   : > { %v1805_v12 = vsel %vm4060_vm9, %v3857_v24, %v1802_v57  ;;  %v2294_v11 = vmin.u32 %v1263_v13, %v4091_v34  ;;  %v2054_v28 = vor.u32 %v2053_v37, %v2052_v45  ;;  %v2059_v18 = vshrl.u32 %v2733_v38, %v2044_v15 }
 0x26a   : > { %2642 = vcosq.f32 %v1805_v12  ;;  %v2057_v4 = vor.u32 %v2056_v17, %v2055_v0  ;;  %vm1199_vm0 = vcmp.lt.s32.totalorder %v3866_v52, 0  ;;  %v4114_v30 = vshll.u32 %v2037_v16, 8 }
 0x26b   : > { %2644 = vsinq.f32 %v1805_v12  ;;  %v1265_v32 = vclz %v2294_v11  ;;  %v1093_v23 = vand.u32 2147483647, %v4082_v3  ;;  %v1283_v5 = vsub.s32 4, %v4080_v53 }
 0x26c   : > { %v2045_v50 = vshrl.u32 %v2728_v21, %v2044_v15  ;;  %v2060_v63 = vor.u32 %v2059_v18, %v2058_v43  ;;  %v1097_v20 = vshrl.u32 %v1096_v6, 23  ;;  %vm2061_vm2 = vcmp.lt.s32.totalorder %v4095_v36, 1 }
 0x26d   : > { %v2295_v44 = vadd.s32 4294967294, %v1265_v32  ;;  %vm2063_vm3 = vcmp.lt.s32.totalorder %v4095_v36, 3  ;;  %vm2064_vm4 = vcmp.lt.s32.totalorder %v4095_v36, 4  ;;  %v2069_v10 = vsel %vm2061_vm2, %v2048_v46, %v2051_v22 }
 0x26e   : > { %v2066_v33 = vsel %vm2064_vm4, %v2054_v28, 2102212464  ;;  %v2070_v61 = vsel %vm2064_vm4, %v2057_v4, 920167782  ;;  %v2073_v39 = vsel %vm2061_vm2, %v2051_v22, %v2054_v28  ;;  %vm4124_vm5 = vcmp.le.f32.partialorder %v1197_v62, 0.7853982 }
 0x26f   : > { %vm2296_vm6 = vcmp.lt.s32.totalorder %v2295_v44, 0  ;;  %vm2062_vm7 = vcmp.lt.s32.totalorder %v4095_v36, 2  ;;  %v2071_v41 = vsel %vm2063_vm3, %v2054_v28, %v2070_v61  ;;  %v2074_v59 = vsel %vm2064_vm4, %v2060_v63, 1326507024 }
 0x270   : > { %vm1812_vm8 = vcmp.lt.s32.totalorder %v4087_v51, 2  ;;  %v1268_v40 = vsel %vm2296_vm6, 0, %v2295_v44  ;;  %v2065_v1 = vsel %vm2061_vm2, %v2045_v50, %v2048_v46  ;;  %v2072_v55 = vsel %vm2062_vm7, %v2069_v10, %v2071_v41 }
 0x271   : > { %v2075_v62 = vsel %vm2063_vm3, %v2057_v4, %v2074_v59  ;;  %vm1809_vm9 = vweird.f32 %v3857_v24  ;;  %v1269_v7 = vsub.s32 32, %v1268_v40  ;;  %v1273_v9 = vsub.s32 4294967266, %v1268_v40 }
 0x272   : > { %v2067_v54 = vsel %vm2063_vm3, %v2051_v22, %v2066_v33  ;;  %v2076_v15 = vsel %vm2062_vm7, %v2073_v39, %v2075_v62  ;;  %v4146_v16 = vmul.u32.u64.low %v4114_v30, %v2072_v55  ;;  %v4147_v60 = vmul.u32.u64.high %v4114_v30, %v2072_v55, %v4146_v16 }
 0x273   : > { %v4142_v14 = vmul.u32.u64.low %v4114_v30, %v2076_v15  ;;  %v4143_v19 = vmul.u32.u64.high %v4114_v30, %v2076_v15, %v4142_v14  ;;  %v1270_v6 = vshll.u32 %v4091_v34, %v1268_v40  ;;  %v1271_v35 = vshrl.u32 %v1253_v48, %v1269_v7 }
 0x274   : > { %v1274_v47 = vadd.s32 127, %v1273_v9  ;;  %v2289_v58 = vadd.s32 4294967169, %v1097_v20  ;;  %v2643_v13 = vpop.eup %2642  ;;  %vm1813_vm10 = vcmp.eq.s32.totalorder %v4087_v51, 0  ;;  %vm1816_vm11 = vcmp.eq.s32.totalorder %v4087_v51, 2 }
 0x275   : > { %v1284_v42 = vsel %vm1199_vm0, %v1283_v5, %v4080_v53  ;;  %v2068_v45 = vsel %vm2062_vm7, %v2065_v1, %v2067_v54  ;;  %v2645_v37 = vpop.eup %2644  ;;  %v1817_v57 = vxor.u32 2147483648, %v2643_v13  ;;  %v1272_v46 = vor.u32 %v1271_v35, %v1270_v6 }
 0x276   : > { %v1275_v0 = vshll.u32 %v1274_v47, 23  ;;  %v1103_v34 = vadd.s32 1, %v2289_v58  ;;  %v1814_v48 = vxor.u32 2147483648, %v2645_v37  ;;  %vm2086_vm12 = vc.u32 %v4143_v19, %v4146_v16 }
 0x277   : > { %v2087_v17 = vadd.s32 1, %v4147_v60  ;;  %v1100_v12 = vand.u32 8388607, %v1093_v23  ;;  %v1818_v11 = vsel %vm1816_vm11, %v1817_v57, %v2645_v37  ;;  %v2084_v36 = vmul.u32 %v4114_v30, %v2068_v45 }
 0x278   : > { %v1276_v53 = vor.u32 4788187, %v1275_v0  ;;  %vm1104_vm13 = vcmp.gt.s32.totalorder %v1103_v34, 0  ;;  %v1815_v22 = vsel %vm1813_vm10, %v2643_v13, %v1814_v48  ;;  %v1286_v28 = vsel %vm4124_vm5, 0, %v1284_v42 }
 0x279   : > { %v2088_v4 = vsel %vm2086_vm12, %v2087_v17, %v4147_v60  ;;  %v1105_v43 = vsel %vm1104_vm13, %v1103_v34, 0  ;;  %v1819_v18 = vsel %vm1812_vm8, %v1815_v22, %v1818_v11  ;;  %v1279_v5 = vcvt.s32.f32 %v1272_v46 }
 0x27a   : > { %v1277_v32 = vand.u32 2147483647, %v1276_v53  ;;  %v2089_v50 = vadd.s32 %v2088_v4, %v2084_v36  ;;  %v1820_v63 = vsel %vm1809_vm9, nan, %v1819_v18  ;;  %v1107_v30 = vand.u32 31, %v1105_v43 }
 0x27b   : > { %2145 = vst [vmem:[%s3292_s29 + $0x60] sm:$0xff] %v1820_v63  ;;  %v445_v33 = vadd.f32 %v4012_v49, %v3748_v8  ;;  %v1290_v10 = vadd.s32 3, %v1286_v28  ;;  %v1101_v61 = vor.u32 8388608, %v1100_v12  ;;  %v1106_v39 = vshrl.u32 %v1105_v43, 5 }
 0x27c   : > { %v1280_v20 = vmul.f32 %v1279_v5, %v1277_v32  ;;  %v2090_v44 = vadd.s32 536870912, %v2089_v50  ;;  %v1108_v41 = vsub.s32 32, %v1107_v30  ;;  %v1110_v40 = vshll.u32 %v2728_v21, %v1107_v30 }
 0x27d   : > { %v1113_v1 = vshll.u32 %v2729_v25, %v1107_v30  ;;  %v1116_v62 = vshll.u32 %v2730_v27, %v1107_v30  ;;  %v1119_v9 = vshll.u32 %v2731_v29, %v1107_v30  ;;  %v1291_v35 = vand.u32 3, %v1290_v10 }
 0x27e   : > { %v1281_v59 = vxor.u32 2147483648, %v1280_v20  ;;  %v4176_v51 = vshrl.u32 %v2090_v44, 30  ;;  %v1111_v24 = vshrl.u32 %v2729_v25, %v1108_v41  ;;  %v1114_v55 = vshrl.u32 %v2730_v27, %v1108_v41 }
 0x27f   : > { %v1117_v7 = vshrl.u32 %v2731_v29, %v1108_v41  ;;  %v1120_v54 = vshrl.u32 %v2732_v31, %v1108_v41  ;;  %v1122_v13 = vshll.u32 %v2732_v31, %v1107_v30  ;;  %v1123_v42 = vshrl.u32 %v2733_v38, %v1108_v41 }
 0x280   : > { %v1282_v8 = vsel %vm1199_vm0, %v1281_v59, %v1280_v20  ;;  %v2092_v49 = vshll.u32 %v4176_v51, 30  ;;  %v1112_v14 = vor.u32 %v1111_v24, %v1110_v40  ;;  %v1115_v60 = vor.u32 %v1114_v55, %v1113_v1 }
 0x281   : > { %v1285_v15 = vsel %vm4124_vm5, %v3866_v52, %v1282_v8  ;;  %v1118_v6 = vor.u32 %v1117_v7, %v1116_v62  ;;  %v1121_v58 = vor.u32 %v1120_v54, %v1119_v9  ;;  %v4196_v45 = vmul.f32 30.0, %v445_v33 }
 0x282   : > { %2646 = vcosq.f32 %v1285_v15  ;;  %v4192_v47 = vsub.s32 %v2089_v50, %v2092_v49  ;;  %vm1125_vm14 = vcmp.lt.s32.totalorder %v1106_v39, 1  ;;  %vm1127_vm15 = vcmp.lt.s32.totalorder %v1106_v39, 3 }
 0x283   : > { %2648 = vsinq.f32 %v1285_v15  ;;  %vm1128_vm1 = vcmp.lt.s32.totalorder %v1106_v39, 4  ;;  %v1124_v26 = vor.u32 %v1123_v42, %v1122_v13  ;;  %v1133_v46 = vsel %vm1125_vm14, %v1112_v14, %v1115_v60 }
 0x284   : > { %v2095_v37 = vsub.s32 0, %v4192_v47  ;;  %v1130_v57 = vsel %vm1128_vm1, %v1118_v6, 2102212464  ;;  %v1134_v0 = vsel %vm1128_vm1, %v1121_v58, 920167782  ;;  %v1109_v48 = vshrl.u32 %v2728_v21, %v1108_v41 }
 0x285   : > { %vm1126_vm0 = vcmp.lt.s32.totalorder %v1106_v39, 2  ;;  %v1135_v17 = vsel %vm1127_vm15, %v1118_v6, %v1134_v0  ;;  %v1137_v11 = vsel %vm1125_vm14, %v1115_v60, %v1118_v6  ;;  %v1138_v53 = vsel %vm1128_vm1, %v1124_v26, 1326507024 }
 0x286   : > { %v2326_v34 = vmin.u32 %v2095_v37, %v4192_v47  ;;  %v1136_v12 = vsel %vm1126_vm0, %v1133_v46, %v1135_v17  ;;  %v1141_v36 = vshll.u32 %v1101_v61, 8  ;;  %v1129_v28 = vsel %vm1125_vm14, %v1109_v48, %v1112_v14 }
 0x287   : > { %v1131_v4 = vsel %vm1127_vm15, %v1115_v60, %v1130_v57  ;;  %v1139_v43 = vsel %vm1127_vm15, %v1121_v58, %v1138_v53  ;;  %vm1292_vm2 = vcmp.lt.s32.totalorder %v1291_v35, 2  ;;  %v1928_v63 = vand.u32 2139095040, %v4196_v45 }
 0x288   : > { %v2097_v22 = vclz %v2326_v34  ;;  %v4208_v18 = vmul.u32.u64.low %v1141_v36, %v1136_v12  ;;  %v4209_v32 = vmul.u32.u64.high %v1141_v36, %v1136_v12, %v4208_v18  ;;  %v1140_v50 = vsel %vm1126_vm0, %v1137_v11, %v1139_v43 }
 0x289   : > { %vm1293_vm3 = vcmp.eq.s32.totalorder %v1291_v35, 0  ;;  %v1132_v30 = vsel %vm1126_vm0, %v1129_v28, %v1131_v4  ;;  %v4215_v20 = vmul.u32.u64.low %v1141_v36, %v1140_v50  ;;  %v4216_v44 = vmul.u32.u64.high %v1141_v36, %v1140_v50, %v4215_v20 }
 0x28a   : > { %v2327_v5 = vadd.s32 4294967294, %v2097_v22  ;;  %vm1296_vm4 = vcmp.eq.s32.totalorder %v1291_v35, 2  ;;  %v2085_v10 = vadd.s32 %v4146_v16, %v4143_v19  ;;  %v1929_v61 = vshrl.u32 %v1928_v63, 23 }
 0x28b   : > { %v2115_v1 = vsub.s32 4, %v4176_v51  ;;  %v1151_v24 = vadd.s32 1, %v4209_v32  ;;  %v1148_v7 = vmul.u32 %v1141_v36, %v1132_v30  ;;  %vm1150_vm6 = vc.u32 %v4216_v44, %v4208_v18 }
 0x28c   : > { %v2647_v33 = vpop.eup %2646  ;;  %vm2328_vm5 = vcmp.lt.s32.totalorder %v2327_v5, 0  ;;  %v2321_v19 = vadd.s32 4294967169, %v1929_v61  ;;  %vm1289_vm7 = vweird.f32 %v3866_v52  ;;  %vm2031_vm8 = vcmp.lt.s32.totalorder %v4033_v56, 0 }
 0x28d   : > { %v2649_v41 = vpop.eup %2648  ;;  %v1297_v59 = vxor.u32 2147483648, %v2647_v33  ;;  %v2100_v40 = vsel %vm2328_vm5, 0, %v2327_v5  ;;  %v1152_v15 = vsel %vm1150_vm6, %v1151_v24, %v4209_v32  ;;  %v2116_v42 = vsel %vm2031_vm8, %v2115_v1, %v4176_v51 }
 0x28e   : > { %v1294_v55 = vxor.u32 2147483648, %v2649_v41  ;;  %v2101_v39 = vsub.s32 32, %v2100_v40  ;;  %v2105_v62 = vsub.s32 4294967266, %v2100_v40  ;;  %v2102_v49 = vshll.u32 %v4192_v47, %v2100_v40 }
 0x28f   : > { %v1298_v8 = vsel %vm1296_vm4, %v1297_v59, %v2649_v41  ;;  %v1153_v60 = vadd.s32 %v1152_v15, %v1148_v7  ;;  %v1935_v6 = vadd.s32 1, %v2321_v19  ;;  %vm4236_vm10 = vcmp.le.f32.partialorder %v2029_v2, 0.7853982 }
 0x290   : > { %v1295_v16 = vsel %vm1293_vm3, %v2647_v33, %v1294_v55  ;;  %v2103_v9 = vshrl.u32 %v2085_v10, %v2101_v39  ;;  %v2106_v54 = vadd.s32 127, %v2105_v62  ;;  %v1925_v46 = vand.u32 2147483647, %v4196_v45 }
 0x291   : > { %v1299_v14 = vsel %vm1292_vm2, %v1295_v16, %v1298_v8  ;;  %v1154_v37 = vadd.s32 536870912, %v1153_v60  ;;  %vm1936_vm9 = vcmp.gt.s32.totalorder %v1935_v6, 0  ;;  %v2118_v51 = vsel %vm4236_vm10, 0, %v2116_v42 }
 0x292   : > { %v1300_v58 = vsel %vm1289_vm7, nan, %v1299_v14  ;;  %v2104_v47 = vor.u32 %v2103_v9, %v2102_v49  ;;  %v2107_v13 = vshll.u32 %v2106_v54, 23  ;;  %v1937_v57 = vsel %vm1936_vm9, %v1935_v6, 0 }
 0x293   : > { %2140 = vst [vmem:[%s3292_s29 + $0x38] sm:$0xff] %v1300_v58  ;;  %v4240_v35 = vshrl.u32 %v1154_v37, 30  ;;  %v1939_v0 = vand.u32 31, %v1937_v57  ;;  %v2122_v53 = vadd.s32 3, %v2118_v51  ;;  %v1932_v2 = vand.u32 8388607, %v1925_v46 }
 0x294   : > { %v2108_v26 = vor.u32 4788187, %v2107_v13  ;;  %v2111_v48 = vcvt.s32.f32 %v2104_v47  ;;  %v1938_v33 = vshrl.u32 %v1937_v57, 5  ;;  %vm2121_vm3 = vweird.f32 %v4033_v56 }
 0x295   : > { %v1156_v17 = vshll.u32 %v4240_v35, 30  ;;  %v1940_v12 = vsub.s32 32, %v1939_v0  ;;  %v1942_v4 = vshll.u32 %v2728_v21, %v1939_v0  ;;  %v1945_v50 = vshll.u32 %v2729_v25, %v1939_v0 }
 0x296   : > { %v2109_v34 = vand.u32 2147483647, %v2108_v26  ;;  %v1948_v63 = vshll.u32 %v2730_v27, %v1939_v0  ;;  %v1951_v61 = vshll.u32 %v2731_v29, %v1939_v0  ;;  %v2123_v55 = vand.u32 3, %v2122_v53 }
 0x297   : > { %v4246_v36 = vsub.s32 %v1153_v60, %v1156_v17  ;;  %v1943_v22 = vshrl.u32 %v2729_v25, %v1940_v12  ;;  %v1946_v43 = vshrl.u32 %v2730_v27, %v1940_v12  ;;  %v1949_v32 = vshrl.u32 %v2731_v29, %v1940_v12 }
 0x298   : > { %v2112_v11 = vmul.f32 %v2111_v48, %v2109_v34  ;;  %v1952_v30 = vshrl.u32 %v2732_v31, %v1940_v12  ;;  %v1954_v27 = vshll.u32 %v2732_v31, %v1939_v0  ;;  %v1955_v24 = vshrl.u32 %v2733_v38, %v1940_v12 }
 0x299   : > { %v1159_v5 = vsub.s32 0, %v4246_v36  ;;  %v1944_v10 = vor.u32 %v1943_v22, %v1942_v4  ;;  %v1947_v40 = vor.u32 %v1946_v43, %v1945_v50  ;;  %v1950_v1 = vor.u32 %v1949_v32, %v1948_v63 }
 0x29a   : > { %v2113_v28 = vxor.u32 2147483648, %v2112_v11  ;;  %v1953_v25 = vor.u32 %v1952_v30, %v1951_v61  ;;  %v1933_v62 = vor.u32 8388608, %v1932_v2  ;;  %v1149_v29 = vadd.s32 %v4208_v18, %v4216_v44 }
 0x29b   : > { %v2290_v59 = vmin.u32 %v1159_v5, %v4246_v36  ;;  %v1941_v7 = vshrl.u32 %v2728_v21, %v1940_v12  ;;  %v1956_v8 = vor.u32 %v1955_v24, %v1954_v27  ;;  %vm1957_vm11 = vcmp.lt.s32.totalorder %v1938_v33, 1 }
 0x29c   : > { %v2114_v20 = vsel %vm2031_vm8, %v2113_v28, %v2112_v11  ;;  %vm1959_vm12 = vcmp.lt.s32.totalorder %v1938_v33, 3  ;;  %vm1960_vm13 = vcmp.lt.s32.totalorder %v1938_v33, 4  ;;  %v1965_v19 = vsel %vm1957_vm11, %v1944_v10, %v1947_v40 }
 0x29d   : > { %v2117_v41 = vsel %vm4236_vm10, %v4033_v56, %v2114_v20  ;;  %v1161_v39 = vclz %v2290_v59  ;;  %v1962_v16 = vsel %vm1960_vm13, %v1950_v1, 2102212464  ;;  %v1966_v31 = vsel %vm1960_vm13, %v1953_v25, 920167782 }
 0x29e   : > { %2650 = vcosq.f32 %v2117_v41  ;;  %v1969_v38 = vsel %vm1957_vm11, %v1947_v40, %v1950_v1  ;;  %v1970_v9 = vsel %vm1960_vm13, %v1956_v8, 1326507024  ;;  %vm1958_vm15 = vcmp.lt.s32.totalorder %v1938_v33, 2 }
 0x29f   : > { %2652 = vsinq.f32 %v2117_v41  ;;  %v2291_v49 = vadd.s32 4294967294, %v1161_v39  ;;  %v1967_v54 = vsel %vm1959_vm12, %v1950_v1, %v1966_v31  ;;  %v1971_v18 = vsel %vm1959_vm12, %v1953_v25, %v1970_v9 }
 0x2a0   : > { %v1968_v21 = vsel %vm1958_vm15, %v1965_v19, %v1967_v54  ;;  %v1972_v15 = vsel %vm1958_vm15, %v1969_v38, %v1971_v18  ;;  %v1973_v14 = vshll.u32 %v1933_v62, 8  ;;  %v1961_v58 = vsel %vm1957_vm11, %v1941_v7, %v1944_v10 }
 0x2a1   : > { %vm2292_vm14 = vcmp.lt.s32.totalorder %v2291_v49, 0  ;;  %v1963_v47 = vsel %vm1959_vm12, %v1947_v40, %v1962_v16  ;;  %vm2128_vm1 = vcmp.eq.s32.totalorder %v2123_v55, 2  ;;  %vm2125_vm2 = vcmp.eq.s32.totalorder %v2123_v55, 0 }
 0x2a2   : > { %v1164_v44 = vsel %vm2292_vm14, 0, %v2291_v49  ;;  %v4278_v13 = vmul.u32.u64.low %v1973_v14, %v1972_v15  ;;  %v4279_v42 = vmul.u32.u64.high %v1973_v14, %v1972_v15, %v4278_v13  ;;  %v1964_v48 = vsel %vm1958_vm15, %v1961_v58, %v1963_v47 }
 0x2a3   : > { %v1165_v60 = vsub.s32 32, %v1164_v44  ;;  %v1169_v6 = vsub.s32 4294967266, %v1164_v44  ;;  %v4281_v37 = vmul.u32.u64.low %v1973_v14, %v1968_v21  ;;  %v4282_v26 = vmul.u32.u64.high %v1973_v14, %v1968_v21, %v4281_v37 }
 0x2a4   : > { %v1166_v57 = vshll.u32 %v4246_v36, %v1164_v44  ;;  %v1980_v36 = vmul.u32 %v1973_v14, %v1964_v48  ;;  %vm2124_vm4 = vcmp.lt.s32.totalorder %v2123_v55, 2  ;;  %v1179_v20 = vsub.s32 4, %v4240_v35 }
 0x2a5   : > { %v1167_v52 = vshrl.u32 %v1149_v29, %v1165_v60  ;;  %v1170_v0 = vadd.s32 127, %v1169_v6  ;;  %vm1982_vm0 = vc.u32 %v4279_v42, %v4281_v37  ;;  %v1983_v2 = vadd.s32 1, %v4282_v26 }
 0x2a6   : > { %vm1095_vm5 = vcmp.lt.s32.totalorder %v4082_v3, 0  ;;  %vm1094_vm6 = vcmp.le.f32.partialorder %v1093_v23, 0.7853982  ;;  %v1981_v16 = vadd.s32 %v4281_v37, %v4279_v42  ;;  %vm1185_vm11 = vweird.f32 %v4082_v3 }
 0x2a7   : > { %v1168_v12 = vor.u32 %v1167_v52, %v1166_v57  ;;  %v1171_v11 = vshll.u32 %v1170_v0, 23  ;;  %v1984_v43 = vsel %vm1982_vm0, %v1983_v2, %v4282_v26  ;;  %v1180_v56 = vsel %vm1095_vm5, %v1179_v20, %v4240_v35 }
 0x2a8   : > { %v2651_v34 = vpop.eup %2650  ;;  %v1985_v63 = vadd.s32 %v1984_v43, %v1980_v36  ;;  %v1182_v25 = vsel %vm1094_vm6, 0, %v1180_v56  ;;  %vm1927_vm12 = vcmp.lt.s32.totalorder %v4196_v45, 0  ;;  %vm1926_vm13 = vcmp.le.f32.partialorder %v1925_v46, 0.7853982 }
 0x2a9   : > { %v2653_v51 = vpop.eup %2652  ;;  %v2129_v17 = vxor.u32 2147483648, %v2651_v34  ;;  %v1172_v28 = vor.u32 4788187, %v1171_v11  ;;  %v1175_v50 = vcvt.s32.f32 %v1168_v12  ;;  %v1186_v55 = vadd.s32 3, %v1182_v25 }
 0x2aa   : > { %v2126_v53 = vxor.u32 2147483648, %v2653_v51  ;;  %v1986_v10 = vadd.s32 536870912, %v1985_v63  ;;  %vm2017_vm0 = vweird.f32 %v4196_v45 }
 0x2ab   : > { %v2130_v22 = vsel %vm2128_vm1, %v2129_v17, %v2653_v51  ;;  %v1173_v5 = vand.u32 2147483647, %v1172_v28  ;;  %v1187_v29 = vand.u32 3, %v1186_v55 }
 0x2ac   : > { %v2127_v4 = vsel %vm2125_vm2, %v2651_v34, %v2126_v53  ;;  %v1987_v41 = vshrl.u32 %v1986_v10, 30 }
 0x2ad   : > { %v2131_v32 = vsel %vm2124_vm4, %v2127_v4, %v2130_v22  ;;  %v1176_v33 = vmul.f32 %v1175_v50, %v1173_v5  ;;  %vm1192_vm8 = vcmp.eq.s32.totalorder %v1187_v29, 2  ;;  %vm1188_vm9 = vcmp.lt.s32.totalorder %v1187_v29, 2 }
 0x2ae   : > { %v2132_v30 = vsel %vm2121_vm3, nan, %v2131_v32  ;;  %v1988_v40 = vshll.u32 %v1987_v41, 30  ;;  %vm1189_vm10 = vcmp.eq.s32.totalorder %v1187_v29, 0  ;;  %v2011_v37 = vsub.s32 4, %v1987_v41 }
 0x2af   : > { %2148 = vst [vmem:[%s3292_s29 + $0x78] sm:$0xff] %v2132_v30  ;;  %v1177_v61 = vxor.u32 2147483648, %v1176_v33 }
 0x2b0   : > { %v1989_v27 = vsub.s32 %v1985_v63, %v1988_v40 }
 0x2b1   : > { %v1178_v59 = vsel %vm1095_vm5, %v1177_v61, %v1176_v33 }
 0x2b2   : > { %v1181_v1 = vsel %vm1094_vm6, %v4082_v3, %v1178_v59  ;;  %v1991_v24 = vsub.s32 0, %v1989_v27  ;;  %v2012_v3 = vsel %vm1927_vm12, %v2011_v37, %v1987_v41 }
 0x2b3   : > { %2654 = vcosq.f32 %v1181_v1  ;;  %v2014_v0 = vsel %vm1926_vm13, 0, %v2012_v3 }
 0x2b4   : > { %2656 = vsinq.f32 %v1181_v1  ;;  %v2322_v39 = vmin.u32 %v1991_v24, %v1989_v27  ;;  %v2018_v34 = vadd.s32 3, %v2014_v0 }
 0x2b6   : > { %v1993_v62 = vclz %v2322_v39  ;;  %v2019_v48 = vand.u32 3, %v2018_v34 }
 0x2b8   : > { %v2323_v7 = vadd.s32 4294967294, %v1993_v62  ;;  %vm2024_vm14 = vcmp.eq.s32.totalorder %v2019_v48, 2  ;;  %vm2021_vm15 = vcmp.eq.s32.totalorder %v2019_v48, 0  ;;  %vm2020_vm1 = vcmp.lt.s32.totalorder %v2019_v48, 2 }
 0x2ba   : > { %vm2324_vm7 = vcmp.lt.s32.totalorder %v2323_v7, 0 }
 0x2bb   : > { %v1996_v23 = vsel %vm2324_vm7, 0, %v2323_v7 }
 0x2bc   : > { %v1997_v31 = vsub.s32 32, %v1996_v23  ;;  %v2001_v38 = vsub.s32 4294967266, %v1996_v23  ;;  %v1998_v18 = vshll.u32 %v1989_v27, %v1996_v23 }
 0x2bd   : > { %v2655_v8 = vpop.eup %2654 }
 0x2be   : > { %v2657_v35 = vpop.eup %2656  ;;  %v1193_v49 = vxor.u32 2147483648, %v2655_v8  ;;  %v1999_v44 = vshrl.u32 %v1981_v16, %v1997_v31  ;;  %v2002_v21 = vadd.s32 127, %v2001_v38 }
 0x2bf   : > { %v1190_v19 = vxor.u32 2147483648, %v2657_v35 }
 0x2c0   : > { %v1194_v9 = vsel %vm1192_vm8, %v1193_v49, %v2657_v35  ;;  %v2000_v60 = vor.u32 %v1999_v44, %v1998_v18  ;;  %v2003_v6 = vshll.u32 %v2002_v21, 23 }
 0x2c1   : > { %v1191_v54 = vsel %vm1189_vm10, %v2655_v8, %v1190_v19 }
 0x2c2   : > { %v1195_v15 = vsel %vm1188_vm9, %v1191_v54, %v1194_v9  ;;  %v2004_v58 = vor.u32 4788187, %v2003_v6  ;;  %v2007_v13 = vcvt.s32.f32 %v2000_v60 }
 0x2c3   : > { %v1196_v14 = vsel %vm1185_vm11, nan, %v1195_v15 }
 0x2c4   : > { %2139 = vst [vmem:[%s3292_s29 + $0x30] sm:$0xff] %v1196_v14  ;;  %v2005_v47 = vand.u32 2147483647, %v2004_v58 }
 0x2c6   : > { %v2008_v42 = vmul.f32 %v2007_v13, %v2005_v47 }
 0x2c8   : > { %v2009_v26 = vxor.u32 2147483648, %v2008_v42 }
 0x2ca   : > { %v2010_v57 = vsel %vm1927_vm12, %v2009_v26, %v2008_v42 }
 0x2cb   : > { %v2013_v52 = vsel %vm1926_vm13, %v4196_v45, %v2010_v57 }
 0x2cc   : > { %2658 = vcosq.f32 %v2013_v52 }
 0x2cd   : > { %2660 = vsinq.f32 %v2013_v52 }
 0x2d6   : > { %v2659_v51 = vpop.eup %2658 }
 0x2d7   : > { %v2661_v17 = vpop.eup %2660  ;;  %v2025_v12 = vxor.u32 2147483648, %v2659_v51 }
 0x2d8   : > { %v2022_v11 = vxor.u32 2147483648, %v2661_v17 }
 0x2d9   : > { %v2026_v46 = vsel %vm2024_vm14, %v2025_v12, %v2661_v17 }
 0x2da   : > { %v2023_v53 = vsel %vm2021_vm15, %v2659_v51, %v2022_v11 }
 0x2db   : > { %v2027_v2 = vsel %vm2020_vm1, %v2023_v53, %v2026_v46 }
 0x2dc   : > { %v2028_v22 = vsel %vm2017_vm0, nan, %v2027_v2 }
 0x2dd   : > { %2147 = vst [vmem:[%s3292_s29 + $0x70] sm:$0xff] %v2028_v22 }
 0x2de   : > { %2677 = shalt.err (!%p2674_p3)
}
 0x2df   : > { %s2678_s26 = scalar_lea.hbm %s4309_s11, 2048  ;;  %s2682_s28 = scalar_lea.hbm %s4361_s3, 8192 }
 0x2e0   : > { %p2679_p4 = scmp.ne.s32.totalorder %s4309_s11, %s2678_s26  ;;  %p2683_p9 = scmp.lt.u32.totalorder %s4309_s11, %s4361_s3 }
 0x2e1   : > { %p2684_p10 = scmp.lt.u32.totalorder %s2682_s28, %s2678_s26  ;;  %p2686_p12 = scmp.lt.u32.totalorder %s2678_s26, %s4309_s11 }
 0x2e2   : > { %p2680_p7 = pnand %p2679_p4, %p2795_p5 }
 0x2e3   : > { %p2685_p11 = por %p2684_p10, %p2683_p9 }
 0x2e4   : > { %p2681_p8 = pneg %p2680_p7 }
 0x2e5   : > { %p2687_p13 = por %p2686_p12, %p2685_p11 }
 0x2e7   : > { %p2688_p0 = pnand %p2687_p13, %p2681_p8 }
 0x2e9   : > { %2691 = shalt.err (!%p2688_p0)
}
 0x2ea   : > { %s2735_s4 = smov 128   ;;  %s2736_s5 = smov 8  }
 0x2eb   : > { %2551 = dma.vmem_to_hbm [thread:$0]  (%p2795_p5), %s4311_s8, 2048, %s4309_s11, %s4317_s16, %s2735_s4, %s2735_s4, %s2736_s5  }
 0x2ec PF: > { %p2557_p1 = scmp.ge.s32.totalorder %s2726_s15, 2  ;;  %s2178_s6 = sand.u32 1, %s2714_s12  }
 0x2ed   : > { %s2179_s7 = scalar_lea.sflag [#allocation3], %s2178_s6 }
 0x2ee   : > { %p2554_p2 = pnand %p2557_p1, %p2799_p6 }
 0x2f0   : > { %2709 = dma.done.wait (!%p2554_p2), %s2179_s7, 2048  }
 0x2f1   : > { %2711 = vsyncadd (!%p2554_p2), %s2179_s7, 4294965248  ;;  %p13_p3 = scmp.ge.s32.totalorder %s2782_s18, 6   ;;  %s4394_s12 = smov %s2718_s13 }
 0x2f2   : > { %s4395_s13 = smov %s2722_s14  ;;  %s4396_s14 = smov %s2793_s21 }
 0x2f3   : > { %s4397_s15 = smov %s2782_s18  ;;  %15 = sbr.rel (!%p13_p3) target bundleno = 3 (0x3), region = 67 }
 0x2fa   :  { %2184 = vsyncpa [#allocation3], 1 }
 0x2fb   :  { %2186 = vsyncpa [#allocation3 + $0x1], 1 }

</bundles_post_ra>
